<compile_context>
chip_gen: v6e
topology: v6e:2x2x1
jax: 0.10.0
libtpu: 0.0.40
codegen_flags: <defaults>
</compile_context>

<pallas_src>
import functools

import jax
import jax.numpy as jnp
from jax.experimental import pallas as pl
from jax.experimental.pallas import tpu as pltpu

CP = 128          # lane-dense channel padding for all kernel operands/outputs
NUM_CLASSES = 10
NUM_CHANNELS = 1  # MNIST


def _round_up(x, m):
    return (x + m - 1) // m * m


def _pad2(w, rows, cols):
    r, c = w.shape
    return jnp.pad(w, ((0, rows - r), (0, cols - c)))


def _pad_bias(b, cols):
    return jnp.pad(b.reshape(1, -1), ((0, 0), (0, cols - b.shape[0])))


def _pick_row_tile(m, cap=256):
    """Largest divisor of m that is a multiple of 8 and <= cap (else full m)."""
    if m <= cap:
        return m
    best = None
    for t in range(8, cap + 1, 8):
        if m % t == 0:
            best = t
    return best if best is not None else m


# ---------------- fused conv (im2col matmul) + bias + 2x2 max-pool + ReLU ----------------

def _conv_pool_relu_kernel(a00_ref, a01_ref, a10_ref, a11_ref, w_ref, b_ref, o_ref):
    # a*: (tmo, Kp) bf16 patch matrices for the 4 positions of each 2x2 pool
    # window; w: (Kp, Cp) bf16; b: (1, Cp) f32; o: (tmo, Cp) f32.
    w = w_ref[...]
    z00 = jnp.dot(a00_ref[...], w, preferred_element_type=jnp.float32)
    z01 = jnp.dot(a01_ref[...], w, preferred_element_type=jnp.float32)
    z10 = jnp.dot(a10_ref[...], w, preferred_element_type=jnp.float32)
    z11 = jnp.dot(a11_ref[...], w, preferred_element_type=jnp.float32)
    # max-pool commutes with the per-channel bias add and with ReLU, so this
    # equals relu(max_pool2d(conv(x) + bias)).
    z = jnp.maximum(jnp.maximum(z00, z01), jnp.maximum(z10, z11)) + b_ref[...]
    o_ref[...] = jnp.maximum(z, 0.0)


def conv_pool_relu(a4, w, b):
    """a4: list of 4 (Mp, Kp) bf16 patch matrices; w: (Kp, Cp) bf16; b: (1, Cp) f32."""
    Mp, Kp = a4[0].shape
    Cp = w.shape[1]
    tmo = _pick_row_tile(Mp)
    grid = (Mp // tmo,)
    a_spec = pl.BlockSpec((tmo, Kp), lambda i: (i, 0))
    return pl.pallas_call(
        _conv_pool_relu_kernel,
        out_shape=jax.ShapeDtypeStruct((Mp, Cp), jnp.float32),
        grid=grid,
        in_specs=[a_spec, a_spec, a_spec, a_spec,
                  pl.BlockSpec((Kp, Cp), lambda i: (0, 0)),
                  pl.BlockSpec((1, Cp), lambda i: (0, 0))],
        out_specs=pl.BlockSpec((tmo, Cp), lambda i: (i, 0)),
        compiler_params=pltpu.CompilerParams(
            dimension_semantics=("parallel",)),
    )(*a4, w, b)


def _build_pool_patches(x, k_pad):
    """x: (N, H, W, C) f32. 5x5 valid conv patches, grouped by 2x2 pool position.

    Returns 4 bf16 matrices of shape (N*(Ho//2)*(Wo//2), k_pad); taps are in
    (kh, kw, cin) order and zero-padded to k_pad inside the concatenate (no
    separate pad pass over the patch matrix).
    """
    N, H, W, C = x.shape
    Ho, Wo = H - 4, W - 4
    parts = [x[:, kh:kh + Ho, kw:kw + Wo, :] for kh in range(5) for kw in range(5)]
    K = 25 * C
    if k_pad > K:
        parts.append(jnp.zeros((N, Ho, Wo, k_pad - K), x.dtype))
    p = jnp.concatenate(parts, axis=-1).astype(jnp.bfloat16)   # (N, Ho, Wo, k_pad)
    Ho2, Wo2 = Ho // 2, Wo // 2
    a4 = [p[:, ph::2, pw::2, :].reshape(N * Ho2 * Wo2, k_pad)
          for ph in range(2) for pw in range(2)]
    return a4, Ho2, Wo2


# ---------------- fused head: fc1 + relu + fc2 + log_softmax ----------------

def _head_kernel(x_ref, w1_ref, b1_ref, w2_ref, b2_ref, o_ref, *, num_classes):
    h = jnp.dot(x_ref[...], w1_ref[...],
                preferred_element_type=jnp.float32) + b1_ref[...]
    h = jnp.maximum(h, 0.0)
    # TODO(synk): F.dropout / nn.Dropout2d training-mode stochastic masking not
    # modeled (eval-mode forward => identity).
    logits = jnp.dot(h.astype(jnp.bfloat16), w2_ref[...],
                     preferred_element_type=jnp.float32) + b2_ref[...]
    col = jax.lax.broadcasted_iota(jnp.int32, logits.shape, 1)
    valid = col < num_classes
    masked = jnp.where(valid, logits, jnp.full_like(logits, -1e30))
    m = jnp.max(masked, axis=-1, keepdims=True)
    z = logits - m                                  # finite everywhere (no -inf)
    ez = jnp.where(valid, jnp.exp(z), 0.0)
    lse = jnp.log(jnp.sum(ez, axis=-1, keepdims=True))
    o_ref[...] = z - lse


def head(feat, w1, b1, w2, b2, num_classes):
    """feat: (N, F) f32; w1: (Fp, CP) bf16; w2: (CP, CP) bf16; b*: (1, CP) f32."""
    N, F = feat.shape
    Fp = w1.shape[0]
    Np = max(8, _round_up(N, 8))
    x = jnp.pad(feat.astype(jnp.bfloat16), ((0, Np - N), (0, Fp - F)))
    out = pl.pallas_call(
        functools.partial(_head_kernel, num_classes=num_classes),
        out_shape=jax.ShapeDtypeStruct((Np, CP), jnp.float32),
        grid=(1,),
        in_specs=[pl.BlockSpec((Np, Fp), lambda i: (0, 0)),
                  pl.BlockSpec((Fp, CP), lambda i: (0, 0)),
                  pl.BlockSpec((1, CP), lambda i: (0, 0)),
                  pl.BlockSpec((CP, CP), lambda i: (0, 0)),
                  pl.BlockSpec((1, CP), lambda i: (0, 0))],
        out_specs=pl.BlockSpec((Np, CP), lambda i: (0, 0)),
    )(x, w1, b1, w2, b2)
    return out[:N, :num_classes]


# ---------------- parameters ----------------

def init_cnn_mnist(key, num_channels=NUM_CHANNELS, num_classes=NUM_CLASSES):
    ks = jax.random.split(key, 8)

    def conv_w(k, cin, cout):
        fan_in = 25 * cin
        # im2col row order: (kh, kw, cin)
        return jax.random.normal(k, (fan_in, cout), jnp.float32) / fan_in ** 0.5

    def lin_w(k, fin, fout):
        return jax.random.normal(k, (fin, fout), jnp.float32) / fin ** 0.5

    k1p = _round_up(25 * num_channels, 128)
    k2p = _round_up(25 * 10, 128)
    fkp = _round_up(320, 128)

    w1 = conv_w(ks[0], num_channels, 10)
    b1 = jax.random.normal(ks[1], (10,), jnp.float32) * 0.01
    w2 = conv_w(ks[2], 10, 20)
    b2 = jax.random.normal(ks[3], (20,), jnp.float32) * 0.01
    # fc1 rows are in (h, w, c) order of the flattened 4x4x20 feature map
    # (equivalent model up to a fixed permutation of the randomly-init weights).
    fw1 = lin_w(ks[4], 320, 50)
    fb1 = jax.random.normal(ks[5], (50,), jnp.float32) * 0.01
    fw2 = lin_w(ks[6], 50, num_classes)
    fb2 = jax.random.normal(ks[7], (num_classes,), jnp.float32) * 0.01

    return {
        "w1": _pad2(w1, k1p, CP).astype(jnp.bfloat16),
        "b1": _pad_bias(b1, CP),
        "w2": _pad2(w2, k2p, CP).astype(jnp.bfloat16),
        "b2": _pad_bias(b2, CP),
        "fw1": _pad2(fw1, fkp, CP).astype(jnp.bfloat16),
        "fb1": _pad_bias(fb1, CP),
        "fw2": _pad2(fw2, CP, CP).astype(jnp.bfloat16),
        "fb2": _pad_bias(fb2, CP),
    }


# ---------------- forward ----------------

def cnn_mnist_forward(params, x_nchw, num_classes=NUM_CLASSES):
    x = jnp.transpose(x_nchw, (0, 2, 3, 1)).astype(jnp.float32)   # NCHW -> NHWC
    N = x.shape[0]

    # conv1 -> max_pool2d(2) -> relu   (one fused kernel)
    a1, H1, W1 = _build_pool_patches(x, params["w1"].shape[0])
    h1 = conv_pool_relu(a1, params["w1"], params["b1"])            # (N*H1*W1, 128)
    act1 = h1[:, :10].reshape(N, H1, W1, 10)                       # 12x12x10

    # conv2 -> Dropout2d (eval: identity) -> max_pool2d(2) -> relu (one fused kernel)
    # TODO(synk): nn.Dropout2d training-mode channel masking not modeled.
    a2, H2, W2 = _build_pool_patches(act1, params["w2"].shape[0])
    h2 = conv_pool_relu(a2, params["w2"], params["b2"])            # (N*H2*W2, 128)

    # flatten (per-sample (h, w, c) order, consistent with fc1 row ordering)
    feat = h2[:, :20].reshape(N, H2 * W2 * 20)                     # (N, 320)

    # fc1 + relu + fc2 + log_softmax (one fused kernel)
    return head(feat, params["fw1"], params["fb1"],
                params["fw2"], params["fb2"], num_classes)


if __name__ == "__main__":
    key = jax.random.PRNGKey(0)
    pkey, xkey = jax.random.split(key)
    params = init_cnn_mnist(pkey, num_channels=NUM_CHANNELS, num_classes=NUM_CLASSES)
    x = jax.random.normal(xkey, (2, NUM_CHANNELS, 28, 28), jnp.float32)  # MNIST-sized

    fwd = jax.jit(cnn_mnist_forward, static_argnums=(2,))
    out = fwd(params, x, NUM_CLASSES)
    out = jax.block_until_ready(out)

    assert out.shape == (2, NUM_CLASSES), out.shape
    assert bool(jnp.all(jnp.isfinite(out)))
    # log_softmax rows must sum (in prob space) to ~1
    row_sums = jnp.sum(jnp.exp(out), axis=1)
    assert bool(jnp.all(jnp.abs(row_sums - 1.0) < 1e-4)), row_sums
    print("KERNEL_OK")
</pallas_src>

<mosaic_0001>
module attributes {stable_mosaic.version = 11 : i64} {
  func.func @_conv_pool_relu_kernel(%arg0: i32, %arg1: memref<144x128xbf16, #tpu.memory_space<vmem>>, %arg2: memref<144x128xbf16, #tpu.memory_space<vmem>>, %arg3: memref<144x128xbf16, #tpu.memory_space<vmem>>, %arg4: memref<144x128xbf16, #tpu.memory_space<vmem>>, %arg5: memref<128x128xbf16, #tpu.memory_space<vmem>>, %arg6: memref<1x128xf32, #tpu.memory_space<vmem>>, %arg7: memref<144x128xf32, #tpu.memory_space<vmem>>) attributes {dimension_semantics = [#tpu.dimension_semantics<parallel>], iteration_bounds = array<i64: 2>, scalar_prefetch = 0 : i64, scratch_operands = 0 : i64, tpu.core_type = #tpu.core_type<tc>, window_params = [{transform_indices = @transform_0, window_bounds = array<i64: 144, 128>}, {transform_indices = @transform_1, window_bounds = array<i64: 144, 128>}, {transform_indices = @transform_2, window_bounds = array<i64: 144, 128>}, {transform_indices = @transform_3, window_bounds = array<i64: 144, 128>}, {pipeline_mode = #tpu.pipeline_mode<synchronous>, transform_indices = @transform_4, window_bounds = array<i64: 128, 128>}, {pipeline_mode = #tpu.pipeline_mode<synchronous>, transform_indices = @transform_5, window_bounds = array<i64: 1, 128>}, {transform_indices = @transform_6, window_bounds = array<i64: 144, 128>}]} {
    %c0 = arith.constant 0 : index
    %c0_0 = arith.constant 0 : index
    %0 = vector.load %arg5[%c0, %c0_0] : memref<128x128xbf16, #tpu.memory_space<vmem>>, vector<128x128xbf16>
    %c0_1 = arith.constant 0 : index
    %c0_2 = arith.constant 0 : index
    %1 = vector.load %arg1[%c0_1, %c0_2] : memref<144x128xbf16, #tpu.memory_space<vmem>>, vector<144x128xbf16>
    %cst = arith.constant dense<0.000000e+00> : vector<144x128xf32>
    %2 = tpu.matmul %1, %0, %cst {dimension_numbers = #tpu.dot_dimension_numbers<[1], [0], [0], [1], [0, 0, 1, 1], [], []>} : vector<144x128xbf16>, vector<128x128xbf16>, vector<144x128xf32> -> vector<144x128xf32>
    %c0_3 = arith.constant 0 : index
    %c0_4 = arith.constant 0 : index
    %3 = vector.load %arg2[%c0_3, %c0_4] : memref<144x128xbf16, #tpu.memory_space<vmem>>, vector<144x128xbf16>
    %cst_5 = arith.constant dense<0.000000e+00> : vector<144x128xf32>
    %4 = tpu.matmul %3, %0, %cst_5 {dimension_numbers = #tpu.dot_dimension_numbers<[1], [0], [0], [1], [0, 0, 1, 1], [], []>} : vector<144x128xbf16>, vector<128x128xbf16>, vector<144x128xf32> -> vector<144x128xf32>
    %c0_6 = arith.constant 0 : index
    %c0_7 = arith.constant 0 : index
    %5 = vector.load %arg3[%c0_6, %c0_7] : memref<144x128xbf16, #tpu.memory_space<vmem>>, vector<144x128xbf16>
    %cst_8 = arith.constant dense<0.000000e+00> : vector<144x128xf32>
    %6 = tpu.matmul %5, %0, %cst_8 {dimension_numbers = #tpu.dot_dimension_numbers<[1], [0], [0], [1], [0, 0, 1, 1], [], []>} : vector<144x128xbf16>, vector<128x128xbf16>, vector<144x128xf32> -> vector<144x128xf32>
    %c0_9 = arith.constant 0 : index
    %c0_10 = arith.constant 0 : index
    %7 = vector.load %arg4[%c0_9, %c0_10] : memref<144x128xbf16, #tpu.memory_space<vmem>>, vector<144x128xbf16>
    %cst_11 = arith.constant dense<0.000000e+00> : vector<144x128xf32>
    %8 = tpu.matmul %7, %0, %cst_11 {dimension_numbers = #tpu.dot_dimension_numbers<[1], [0], [0], [1], [0, 0, 1, 1], [], []>} : vector<144x128xbf16>, vector<128x128xbf16>, vector<144x128xf32> -> vector<144x128xf32>
    %9 = arith.maximumf %2, %4 : vector<144x128xf32>
    %10 = arith.maximumf %6, %8 : vector<144x128xf32>
    %11 = arith.maximumf %9, %10 : vector<144x128xf32>
    %c0_12 = arith.constant 0 : index
    %c0_13 = arith.constant 0 : index
    %12 = vector.load %arg6[%c0_12, %c0_13] : memref<1x128xf32, #tpu.memory_space<vmem>>, vector<1x128xf32>
    %13 = vector.broadcast %12 : vector<1x128xf32> to vector<144x128xf32>
    %14 = arith.addf %11, %13 : vector<144x128xf32>
    %cst_14 = arith.constant 0.000000e+00 : f32
    %15 = vector.broadcast %cst_14 : f32 to vector<144x128xf32>
    %16 = arith.maximumf %14, %15 : vector<144x128xf32>
    %c0_15 = arith.constant 0 : index
    %c0_16 = arith.constant 0 : index
    %17 = vector.load %arg7[%c0_15, %c0_16] : memref<144x128xf32, #tpu.memory_space<vmem>>, vector<144x128xf32>
    tpu.vector_store %arg7[%c0_15, %c0_16], %16 {strides = array<i32>} : memref<144x128xf32, #tpu.memory_space<vmem>>, vector<144x128xf32>,
    return
  }
  func.func @transform_0(%arg0: i32) -> (i32, i32) {
    %c0_i32 = arith.constant 0 : i32
    %c0_i32_0 = arith.constant 0 : i32
    return %arg0, %c0_i32 : i32, i32
  }
  func.func @transform_1(%arg0: i32) -> (i32, i32) {
    %c0_i32 = arith.constant 0 : i32
    %c0_i32_0 = arith.constant 0 : i32
    return %arg0, %c0_i32 : i32, i32
  }
  func.func @transform_2(%arg0: i32) -> (i32, i32) {
    %c0_i32 = arith.constant 0 : i32
    %c0_i32_0 = arith.constant 0 : i32
    return %arg0, %c0_i32 : i32, i32
  }
  func.func @transform_3(%arg0: i32) -> (i32, i32) {
    %c0_i32 = arith.constant 0 : i32
    %c0_i32_0 = arith.constant 0 : i32
    return %arg0, %c0_i32 : i32, i32
  }
  func.func @transform_4(%arg0: i32) -> (i32, i32) {
    %c0_i32 = arith.constant 0 : i32
    %c0_i32_0 = arith.constant 0 : i32
    %c0_i32_1 = arith.constant 0 : i32
    return %c0_i32, %c0_i32_0 : i32, i32
  }
  func.func @transform_5(%arg0: i32) -> (i32, i32) {
    %c0_i32 = arith.constant 0 : i32
    %c0_i32_0 = arith.constant 0 : i32
    %c0_i32_1 = arith.constant 0 : i32
    return %c0_i32, %c0_i32_0 : i32, i32
  }
  func.func @transform_6(%arg0: i32) -> (i32, i32) {
    %c0_i32 = arith.constant 0 : i32
    %c0_i32_0 = arith.constant 0 : i32
    return %arg0, %c0_i32 : i32, i32
  }
}

module attributes {stable_mosaic.version = 11 : i64} {
  func.func @_conv_pool_relu_kernel(%arg0: i32, %arg1: memref<32x256xbf16, #tpu.memory_space<vmem>>, %arg2: memref<32x256xbf16, #tpu.memory_space<vmem>>, %arg3: memref<32x256xbf16, #tpu.memory_space<vmem>>, %arg4: memref<32x256xbf16, #tpu.memory_space<vmem>>, %arg5: memref<256x128xbf16, #tpu.memory_space<vmem>>, %arg6: memref<1x128xf32, #tpu.memory_space<vmem>>, %arg7: memref<32x128xf32, #tpu.memory_space<vmem>>) attributes {dimension_semantics = [#tpu.dimension_semantics<parallel>], iteration_bounds = array<i64: 1>, scalar_prefetch = 0 : i64, scratch_operands = 0 : i64, tpu.core_type = #tpu.core_type<tc>, window_params = [{transform_indices = @transform_0, window_bounds = array<i64: 32, 256>}, {transform_indices = @transform_1, window_bounds = array<i64: 32, 256>}, {transform_indices = @transform_2, window_bounds = array<i64: 32, 256>}, {transform_indices = @transform_3, window_bounds = array<i64: 32, 256>}, {pipeline_mode = #tpu.pipeline_mode<synchronous>, transform_indices = @transform_4, window_bounds = array<i64: 256, 128>}, {pipeline_mode = #tpu.pipeline_mode<synchronous>, transform_indices = @transform_5, window_bounds = array<i64: 1, 128>}, {transform_indices = @transform_6, window_bounds = array<i64: 32, 128>}]} {
    %c0 = arith.constant 0 : index
    %c0_0 = arith.constant 0 : index
    %0 = vector.load %arg5[%c0, %c0_0] : memref<256x128xbf16, #tpu.memory_space<vmem>>, vector<256x128xbf16>
    %c0_1 = arith.constant 0 : index
    %c0_2 = arith.constant 0 : index
    %1 = vector.load %arg1[%c0_1, %c0_2] : memref<32x256xbf16, #tpu.memory_space<vmem>>, vector<32x256xbf16>
    %cst = arith.constant dense<0.000000e+00> : vector<32x128xf32>
    %2 = tpu.matmul %1, %0, %cst {dimension_numbers = #tpu.dot_dimension_numbers<[1], [0], [0], [1], [0, 0, 1, 1], [], []>} : vector<32x256xbf16>, vector<256x128xbf16>, vector<32x128xf32> -> vector<32x128xf32>
    %c0_3 = arith.constant 0 : index
    %c0_4 = arith.constant 0 : index
    %3 = vector.load %arg2[%c0_3, %c0_4] : memref<32x256xbf16, #tpu.memory_space<vmem>>, vector<32x256xbf16>
    %cst_5 = arith.constant dense<0.000000e+00> : vector<32x128xf32>
    %4 = tpu.matmul %3, %0, %cst_5 {dimension_numbers = #tpu.dot_dimension_numbers<[1], [0], [0], [1], [0, 0, 1, 1], [], []>} : vector<32x256xbf16>, vector<256x128xbf16>, vector<32x128xf32> -> vector<32x128xf32>
    %c0_6 = arith.constant 0 : index
    %c0_7 = arith.constant 0 : index
    %5 = vector.load %arg3[%c0_6, %c0_7] : memref<32x256xbf16, #tpu.memory_space<vmem>>, vector<32x256xbf16>
    %cst_8 = arith.constant dense<0.000000e+00> : vector<32x128xf32>
    %6 = tpu.matmul %5, %0, %cst_8 {dimension_numbers = #tpu.dot_dimension_numbers<[1], [0], [0], [1], [0, 0, 1, 1], [], []>} : vector<32x256xbf16>, vector<256x128xbf16>, vector<32x128xf32> -> vector<32x128xf32>
    %c0_9 = arith.constant 0 : index
    %c0_10 = arith.constant 0 : index
    %7 = vector.load %arg4[%c0_9, %c0_10] : memref<32x256xbf16, #tpu.memory_space<vmem>>, vector<32x256xbf16>
    %cst_11 = arith.constant dense<0.000000e+00> : vector<32x128xf32>
    %8 = tpu.matmul %7, %0, %cst_11 {dimension_numbers = #tpu.dot_dimension_numbers<[1], [0], [0], [1], [0, 0, 1, 1], [], []>} : vector<32x256xbf16>, vector<256x128xbf16>, vector<32x128xf32> -> vector<32x128xf32>
    %9 = arith.maximumf %2, %4 : vector<32x128xf32>
    %10 = arith.maximumf %6, %8 : vector<32x128xf32>
    %11 = arith.maximumf %9, %10 : vector<32x128xf32>
    %c0_12 = arith.constant 0 : index
    %c0_13 = arith.constant 0 : index
    %12 = vector.load %arg6[%c0_12, %c0_13] : memref<1x128xf32, #tpu.memory_space<vmem>>, vector<1x128xf32>
    %13 = vector.broadcast %12 : vector<1x128xf32> to vector<32x128xf32>
    %14 = arith.addf %11, %13 : vector<32x128xf32>
    %cst_14 = arith.constant 0.000000e+00 : f32
    %15 = vector.broadcast %cst_14 : f32 to vector<32x128xf32>
    %16 = arith.maximumf %14, %15 : vector<32x128xf32>
    %c0_15 = arith.constant 0 : index
    %c0_16 = arith.constant 0 : index
    %17 = vector.load %arg7[%c0_15, %c0_16] : memref<32x128xf32, #tpu.memory_space<vmem>>, vector<32x128xf32>
    tpu.vector_store %arg7[%c0_15, %c0_16], %16 {strides = array<i32>} : memref<32x128xf32, #tpu.memory_space<vmem>>, vector<32x128xf32>,
    return
  }
  func.func @transform_0(%arg0: i32) -> (i32, i32) {
    %c0_i32 = arith.constant 0 : i32
    %c0_i32_0 = arith.constant 0 : i32
    return %arg0, %c0_i32 : i32, i32
  }
  func.func @transform_1(%arg0: i32) -> (i32, i32) {
    %c0_i32 = arith.constant 0 : i32
    %c0_i32_0 = arith.constant 0 : i32
    return %arg0, %c0_i32 : i32, i32
  }
  func.func @transform_2(%arg0: i32) -> (i32, i32) {
    %c0_i32 = arith.constant 0 : i32
    %c0_i32_0 = arith.constant 0 : i32
    return %arg0, %c0_i32 : i32, i32
  }
  func.func @transform_3(%arg0: i32) -> (i32, i32) {
    %c0_i32 = arith.constant 0 : i32
    %c0_i32_0 = arith.constant 0 : i32
    return %arg0, %c0_i32 : i32, i32
  }
  func.func @transform_4(%arg0: i32) -> (i32, i32) {
    %c0_i32 = arith.constant 0 : i32
    %c0_i32_0 = arith.constant 0 : i32
    %c0_i32_1 = arith.constant 0 : i32
    return %c0_i32, %c0_i32_0 : i32, i32
  }
  func.func @transform_5(%arg0: i32) -> (i32, i32) {
    %c0_i32 = arith.constant 0 : i32
    %c0_i32_0 = arith.constant 0 : i32
    %c0_i32_1 = arith.constant 0 : i32
    return %c0_i32, %c0_i32_0 : i32, i32
  }
  func.func @transform_6(%arg0: i32) -> (i32, i32) {
    %c0_i32 = arith.constant 0 : i32
    %c0_i32_0 = arith.constant 0 : i32
    return %arg0, %c0_i32 : i32, i32
  }
}

module attributes {stable_mosaic.version = 11 : i64} {
  func.func @_head_kernel(%arg0: i32, %arg1: memref<8x384xbf16, #tpu.memory_space<vmem>>, %arg2: memref<384x128xbf16, #tpu.memory_space<vmem>>, %arg3: memref<1x128xf32, #tpu.memory_space<vmem>>, %arg4: memref<128x128xbf16, #tpu.memory_space<vmem>>, %arg5: memref<1x128xf32, #tpu.memory_space<vmem>>, %arg6: memref<8x128xf32, #tpu.memory_space<vmem>>) attributes {dimension_semantics = [#tpu.dimension_semantics<arbitrary>], iteration_bounds = array<i64: 1>, scalar_prefetch = 0 : i64, scratch_operands = 0 : i64, tpu.core_type = #tpu.core_type<tc>, window_params = [{pipeline_mode = #tpu.pipeline_mode<synchronous>, transform_indices = @transform_0, window_bounds = array<i64: 8, 384>}, {pipeline_mode = #tpu.pipeline_mode<synchronous>, transform_indices = @transform_1, window_bounds = array<i64: 384, 128>}, {pipeline_mode = #tpu.pipeline_mode<synchronous>, transform_indices = @transform_2, window_bounds = array<i64: 1, 128>}, {pipeline_mode = #tpu.pipeline_mode<synchronous>, transform_indices = @transform_3, window_bounds = array<i64: 128, 128>}, {pipeline_mode = #tpu.pipeline_mode<synchronous>, transform_indices = @transform_4, window_bounds = array<i64: 1, 128>}, {pipeline_mode = #tpu.pipeline_mode<synchronous>, transform_indices = @transform_5, window_bounds = array<i64: 8, 128>}]} {
    %c0 = arith.constant 0 : index
    %c0_0 = arith.constant 0 : index
    %0 = vector.load %arg1[%c0, %c0_0] : memref<8x384xbf16, #tpu.memory_space<vmem>>, vector<8x384xbf16>
    %c0_1 = arith.constant 0 : index
    %c0_2 = arith.constant 0 : index
    %1 = vector.load %arg2[%c0_1, %c0_2] : memref<384x128xbf16, #tpu.memory_space<vmem>>, vector<384x128xbf16>
    %cst = arith.constant dense<0.000000e+00> : vector<8x128xf32>
    %2 = tpu.matmul %0, %1, %cst {dimension_numbers = #tpu.dot_dimension_numbers<[1], [0], [0], [1], [0, 0, 1, 1], [], []>} : vector<8x384xbf16>, vector<384x128xbf16>, vector<8x128xf32> -> vector<8x128xf32>
    %c0_3 = arith.constant 0 : index
    %c0_4 = arith.constant 0 : index
    %3 = vector.load %arg3[%c0_3, %c0_4] : memref<1x128xf32, #tpu.memory_space<vmem>>, vector<1x128xf32>
    %4 = vector.broadcast %3 : vector<1x128xf32> to vector<8x128xf32>
    %5 = arith.addf %2, %4 : vector<8x128xf32>
    %cst_5 = arith.constant 0.000000e+00 : f32
    %6 = vector.broadcast %cst_5 : f32 to vector<8x128xf32>
    %7 = arith.maximumf %5, %6 : vector<8x128xf32>
    %8 = arith.truncf %7 : vector<8x128xf32> to vector<8x128xbf16>
    %c0_6 = arith.constant 0 : index
    %c0_7 = arith.constant 0 : index
    %9 = vector.load %arg4[%c0_6, %c0_7] : memref<128x128xbf16, #tpu.memory_space<vmem>>, vector<128x128xbf16>
    %cst_8 = arith.constant dense<0.000000e+00> : vector<8x128xf32>
    %10 = tpu.matmul %8, %9, %cst_8 {dimension_numbers = #tpu.dot_dimension_numbers<[1], [0], [0], [1], [0, 0, 1, 1], [], []>} : vector<8x128xbf16>, vector<128x128xbf16>, vector<8x128xf32> -> vector<8x128xf32>
    %c0_9 = arith.constant 0 : index
    %c0_10 = arith.constant 0 : index
    %11 = vector.load %arg5[%c0_9, %c0_10] : memref<1x128xf32, #tpu.memory_space<vmem>>, vector<1x128xf32>
    %12 = vector.broadcast %11 : vector<1x128xf32> to vector<8x128xf32>
    %13 = arith.addf %10, %12 : vector<8x128xf32>
    %14 = tpu.iota {dimensions = array<i32: 1>} : vector<8x128xi32>
    %c10_i32 = arith.constant 10 : i32
    %15 = vector.broadcast %c10_i32 : i32 to vector<8x128xi32>
    %16 = arith.cmpi slt, %14, %15 : vector<8x128xi32>
    %cst_11 = arith.constant -1.000000e+30 : f32
    %17 = vector.broadcast %cst_11 : f32 to vector<8x128xf32>
    %18 = arith.select %16, %13, %17 : vector<8x128xi1>, vector<8x128xf32>
    %cst_12 = arith.constant dense<0xFF800000> : vector<8xf32>
    %19 = vector.multi_reduction <maximumf>, %18, %cst_12 [1] : vector<8x128xf32> to vector<8xf32>
    %20 = vector.shape_cast %19 : vector<8xf32> to vector<8x1xf32>
    %21 = vector.broadcast %20 : vector<8x1xf32> to vector<8x128xf32>
    %22 = arith.subf %13, %21 : vector<8x128xf32>
    %23 = math.exp %22 : vector<8x128xf32>
    %cst_13 = arith.constant 0.000000e+00 : f32
    %24 = vector.broadcast %cst_13 : f32 to vector<8x128xf32>
    %25 = arith.select %16, %23, %24 : vector<8x128xi1>, vector<8x128xf32>
    %cst_14 = arith.constant dense<0.000000e+00> : vector<8xf32>
    %26 = vector.multi_reduction <add>, %25, %cst_14 [1] : vector<8x128xf32> to vector<8xf32>
    %27 = vector.shape_cast %26 : vector<8xf32> to vector<8x1xf32>
    %28 = math.log %27 : vector<8x1xf32>
    %29 = vector.broadcast %28 : vector<8x1xf32> to vector<8x128xf32>
    %30 = arith.subf %22, %29 : vector<8x128xf32>
    %c0_15 = arith.constant 0 : index
    %c0_16 = arith.constant 0 : index
    %31 = vector.load %arg6[%c0_15, %c0_16] : memref<8x128xf32, #tpu.memory_space<vmem>>, vector<8x128xf32>
    tpu.vector_store %arg6[%c0_15, %c0_16], %30 {strides = array<i32>} : memref<8x128xf32, #tpu.memory_space<vmem>>, vector<8x128xf32>,
    return
  }
  func.func @transform_0(%arg0: i32) -> (i32, i32) {
    %c0_i32 = arith.constant 0 : i32
    %c0_i32_0 = arith.constant 0 : i32
    %c0_i32_1 = arith.constant 0 : i32
    return %c0_i32, %c0_i32_0 : i32, i32
  }
  func.func @transform_1(%arg0: i32) -> (i32, i32) {
    %c0_i32 = arith.constant 0 : i32
    %c0_i32_0 = arith.constant 0 : i32
    %c0_i32_1 = arith.constant 0 : i32
    return %c0_i32, %c0_i32_0 : i32, i32
  }
  func.func @transform_2(%arg0: i32) -> (i32, i32) {
    %c0_i32 = arith.constant 0 : i32
    %c0_i32_0 = arith.constant 0 : i32
    %c0_i32_1 = arith.constant 0 : i32
    return %c0_i32, %c0_i32_0 : i32, i32
  }
  func.func @transform_3(%arg0: i32) -> (i32, i32) {
    %c0_i32 = arith.constant 0 : i32
    %c0_i32_0 = arith.constant 0 : i32
    %c0_i32_1 = arith.constant 0 : i32
    return %c0_i32, %c0_i32_0 : i32, i32
  }
  func.func @transform_4(%arg0: i32) -> (i32, i32) {
    %c0_i32 = arith.constant 0 : i32
    %c0_i32_0 = arith.constant 0 : i32
    %c0_i32_1 = arith.constant 0 : i32
    return %c0_i32, %c0_i32_0 : i32, i32
  }
  func.func @transform_5(%arg0: i32) -> (i32, i32) {
    %c0_i32 = arith.constant 0 : i32
    %c0_i32_0 = arith.constant 0 : i32
    %c0_i32_1 = arith.constant 0 : i32
    return %c0_i32, %c0_i32_0 : i32, i32
  }
}

</mosaic_0001>

<bundles_post_ra>
// kernel: cnn_mnist_forward.3
= control target key start
LH: loop header
LB: loop body
LE: loop exit
PB: predicated region body
PF: predicated region fallthrough
CT: control target
= control target key end

     0   :  { %s1733_s21 = smov 0   ;;  %s2152_s0 = inlined_call_operand.vmem [shape: bf16[288,128], index: 0, kind: input, shape index: {}]   ;;  %s2153_s1 = inlined_call_operand.vmem [shape: bf16[288,128], index: 1, kind: input, shape index: {}]   ;;  %s2154_s2 = inlined_call_operand.vmem [shape: bf16[288,128], index: 2, kind: input, shape index: {}]   ;;  %s2155_s3 = inlined_call_operand.vmem [shape: bf16[288,128], index: 3, kind: input, shape index: {}]   ;;  %s2156_s4 = inlined_call_operand.vmem [shape: bf16[128,128], index: 4, kind: input, shape index: {}]   ;;  %s2157_s5 = inlined_call_operand.vmem [shape: f32[1,128], index: 5, kind: input, shape index: {}]   ;;  %s2158_s6 = inlined_call_operand.vmem [shape: f32[288,128], index: 6, kind: output, shape index: {}]  }
   0x1 LB: > { %s1301_s22 = sadd.s32 4294967295, %s1694_s21   ;;  %p1305_p0 = scmp.ge.s32.totalorder %s1694_s21, 1  ;;  %s1694_s21 = sphi %s1733_s21, %s16_s21  }
   0x2   : > { %p246_p1 = scmp.lt.s32.totalorder %s1694_s21, 3 }
   0x4   : > { %p247_p2 = pnand %p1305_p0, %p246_p1 }
   0x5   : > { %s291_s27 = smul.u32 (!%p247_p2), 18, %s1301_s22 }
   0x6   : > { %250 = sbr.rel (%p247_p2) target bundleno = 386 (0x182), region = 44 }
   0x7   : > { %p292_p3 = scmp.lt.s32.totalorder (!%p247_p2), %s291_s27, 35 }
   0xb   : > { %v1644_v0 = vld [vmem:[%s2156_s4 + $0x38] sm:$0xff]   ;;  %v1696_v1 = vmov 0.0   ;;  %v1645_v2 = vld [vmem:[%s2156_s4 + $0x30] sm:$0xff]   ;;  %vm1697_vm0 = vmmov 0   ;;  %v1646_v3 = vld [vmem:[%s2156_s4 + $0x28] sm:$0xff]   ;;  %s2161_s27 = smov (!%p292_p3, %s291_s27), 35 }
   0xc   : > { %1426 = vmatprep.subr.bf16.mxu0 %v1696_v1  ;;  %1478 = vmatprep.subr.bf16.mxu1 %v1696_v1  ;;  %s1763_s30 = sshll.u32 %s2161_s27, 2  ;;  %v1647_v4 = vld [vmem:[%s2156_s4 + $0x20] sm:$0xff]   ;;  %v1648_v5 = vld [vmem:[%s2156_s4 + $0x18] sm:$0xff]   ;;  %v1649_v6 = vld [vmem:[%s2156_s4 + $0x10] sm:$0xff]  }
   0xd   : > { %1427 = vmatpush3.bf16.msra.mxu0 %v1644_v0  ;;  %1479 = vmatpush3.bf16.msra.mxu1 %v1644_v0  ;;  %s1769_s9 = scalar_lea.vmem %s2152_s0, %s1763_s30  ;;  %s1778_s14 = scalar_lea.vmem %s2153_s1, %s1763_s30  ;;  %v1650_v7 = vld [vmem:[%s2156_s4 + $0x8] sm:$0xff]   ;;  %v1800_v8 = vld [vmem:[%s2156_s4] sm:$0xff]  }
   0xe   : > { %1428 = vmatprep.subr.bf16.mxu0 %v1696_v1  ;;  %1480 = vmatprep.subr.bf16.mxu1 %v1696_v1  ;;  %s1808_s26 = scalar_lea.vmem %s2154_s2, %s1763_s30  ;;  %v1652_v9 = vld [vmem:[%s1769_s9] sm:$0xff]   ;;  %s1815_s7 = scalar_lea.vmem %s2155_s3, %s1763_s30  ;;  %v1654_v11 = vld [vmem:[%s1769_s9 + $0x8] sm:$0xff]   ;;  %v1656_v13 = vld [vmem:[%s1769_s9 + $0x10] sm:$0xff]  }
   0xf   : > { %1442 = vmatprep.mubr.msk.bf16.mxu0 %vm1697_vm0, %v1696_v1  ;;  %1494 = vmatprep.mubr.msk.bf16.mxu1 %vm1697_vm0, %v1696_v1  ;;  %v1653_v10 = vld [vmem:[%s1778_s14] sm:$0xff]   ;;  %v1655_v12 = vld [vmem:[%s1778_s14 + $0x8] sm:$0xff]   ;;  %v1657_v14 = vld [vmem:[%s1778_s14 + $0x10] sm:$0xff]  }
  0x10   : > { %v1658_v15 = vld [vmem:[%s1769_s9 + $0x18] sm:$0xff]   ;;  %v1660_v17 = vld [vmem:[%s1769_s9 + $0x20] sm:$0xff]   ;;  %v1662_v19 = vld [vmem:[%s1769_s9 + $0x28] sm:$0xff]  }
  0x11   : > { %1429 = vmatpush3.bf16.msra.mxu0 %v1645_v2  ;;  %1481 = vmatpush3.bf16.msra.mxu1 %v1645_v2  ;;  %v1659_v16 = vld [vmem:[%s1778_s14 + $0x18] sm:$0xff]   ;;  %v1661_v18 = vld [vmem:[%s1778_s14 + $0x20] sm:$0xff]   ;;  %v1663_v20 = vld [vmem:[%s1778_s14 + $0x28] sm:$0xff]  }
  0x12   : > { %1430 = vmatprep.subr.bf16.mxu0 %v1696_v1  ;;  %1482 = vmatprep.subr.bf16.mxu1 %v1696_v1  ;;  %v1664_v21 = vld [vmem:[%s1769_s9 + $0x30] sm:$0xff]   ;;  %v1666_v23 = vld [vmem:[%s1769_s9 + $0x38] sm:$0xff]   ;;  %v1668_v25 = vld [vmem:[%s1769_s9 + $0x40] sm:$0xff]   ;;  %s1310_s9 = sshll.u32 %s2161_s27, 3 }
  0x13   : > { %v1665_v22 = vld [vmem:[%s1778_s14 + $0x30] sm:$0xff]   ;;  %v1667_v24 = vld [vmem:[%s1778_s14 + $0x38] sm:$0xff]   ;;  %v1669_v26 = vld [vmem:[%s1778_s14 + $0x40] sm:$0xff]   ;;  %s2061_s12 = scalar_lea.vmem %s2158_s6, %s1310_s9 }
  0x14   : > { %v1670_v27 = vld [vmem:[%s1808_s26] sm:$0xff]   ;;  %v1672_v29 = vld [vmem:[%s1808_s26 + $0x8] sm:$0xff]   ;;  %v1674_v31 = vld [vmem:[%s1808_s26 + $0x10] sm:$0xff]  }
  0x15   : > { %1431 = vmatpush3.bf16.msra.mxu0 %v1646_v3  ;;  %1483 = vmatpush3.bf16.msra.mxu1 %v1646_v3  ;;  %v1671_v28 = vld [vmem:[%s1815_s7] sm:$0xff]   ;;  %v1673_v30 = vld [vmem:[%s1815_s7 + $0x8] sm:$0xff]   ;;  %v1675_v32 = vld [vmem:[%s1815_s7 + $0x10] sm:$0xff]  }
  0x16   : > { %1432 = vmatprep.subr.bf16.mxu0 %v1696_v1  ;;  %1484 = vmatprep.subr.bf16.mxu1 %v1696_v1  ;;  %v1676_v33 = vld [vmem:[%s1808_s26 + $0x18] sm:$0xff]   ;;  %v1678_v35 = vld [vmem:[%s1808_s26 + $0x20] sm:$0xff]   ;;  %v1680_v37 = vld [vmem:[%s1808_s26 + $0x28] sm:$0xff]  }
  0x17   : > { %v1677_v34 = vld [vmem:[%s1815_s7 + $0x18] sm:$0xff]   ;;  %v1679_v36 = vld [vmem:[%s1815_s7 + $0x20] sm:$0xff]   ;;  %v1681_v38 = vld [vmem:[%s1815_s7 + $0x28] sm:$0xff]  }
  0x18   : > { %v1682_v39 = vld [vmem:[%s1808_s26 + $0x30] sm:$0xff]   ;;  %v1684_v41 = vld [vmem:[%s1808_s26 + $0x38] sm:$0xff]   ;;  %v1686_v43 = vld [vmem:[%s1808_s26 + $0x40] sm:$0xff]  }
  0x19   : > { %1433 = vmatpush3.bf16.msra.mxu0 %v1647_v4  ;;  %1485 = vmatpush3.bf16.msra.mxu1 %v1647_v4  ;;  %v1683_v40 = vld [vmem:[%s1815_s7 + $0x30] sm:$0xff]   ;;  %v1685_v42 = vld [vmem:[%s1815_s7 + $0x38] sm:$0xff]   ;;  %v1687_v44 = vld [vmem:[%s1815_s7 + $0x40] sm:$0xff]  }
  0x1a   : > { %1434 = vmatprep.subr.bf16.mxu0 %v1696_v1  ;;  %1486 = vmatprep.subr.bf16.mxu1 %v1696_v1 }
  0x1d   : > { %1435 = vmatpush3.bf16.msra.mxu0 %v1648_v5  ;;  %1487 = vmatpush3.bf16.msra.mxu1 %v1648_v5 }
  0x1e   : > { %1436 = vmatprep.subr.bf16.mxu0 %v1696_v1  ;;  %1488 = vmatprep.subr.bf16.mxu1 %v1696_v1 }
  0x21   : > { %1437 = vmatpush3.bf16.msra.mxu0 %v1649_v6  ;;  %1489 = vmatpush3.bf16.msra.mxu1 %v1649_v6 }
  0x22   : > { %1438 = vmatprep.subr.bf16.mxu0 %v1696_v1  ;;  %1490 = vmatprep.subr.bf16.mxu1 %v1696_v1 }
  0x25   : > { %1439 = vmatpush3.bf16.msra.mxu0 %v1650_v7  ;;  %1491 = vmatpush3.bf16.msra.mxu1 %v1650_v7 }
  0x26   : > { %1440 = vmatprep.subr.bf16.mxu0 %v1696_v1  ;;  %1492 = vmatprep.subr.bf16.mxu1 %v1696_v1 }
  0x29   : > { %1441 = vmatpush3.bf16.msra.mxu0 %v1800_v8  ;;  %1493 = vmatpush3.bf16.msra.mxu1 %v1800_v8 }
  0x2a   : > { %1530 = vmatprep.subr.bf16.mxu0 %v1696_v1  ;;  %1582 = vmatprep.subr.bf16.mxu1 %v1696_v1 }
  0x2c   : > { %1443 = vmatmul.mubr.bf16.vlgmr.msra.gmra.mxu0 %v1652_v9  ;;  %1495 = vmatmul.mubr.bf16.vlgmr.msra.gmra.mxu1 %v1653_v10 }
  0x2d   : > { %1531 = vmatpush3.bf16.msra.mxu0 %v1644_v0  ;;  %1583 = vmatpush3.bf16.msra.mxu1 %v1644_v0 }
  0x2e   : > { %1446 = vmatprep.mubr.msk.bf16.mxu0 %vm1697_vm0, %v1696_v1  ;;  %1498 = vmatprep.mubr.msk.bf16.mxu1 %vm1697_vm0, %v1696_v1 }
  0x2f   : > { %1532 = vmatprep.subr.bf16.mxu0 %v1696_v1  ;;  %1584 = vmatprep.subr.bf16.mxu1 %v1696_v1 }
  0x31   : > { %1533 = vmatpush3.bf16.msra.mxu0 %v1645_v2  ;;  %1585 = vmatpush3.bf16.msra.mxu1 %v1645_v2 }
  0x32   : > { %1534 = vmatprep.subr.bf16.mxu0 %v1696_v1  ;;  %1586 = vmatprep.subr.bf16.mxu1 %v1696_v1 }
  0x34   : > { %1447 = vmatmul.mubr.bf16.gmra.mxu0 %v1654_v11  ;;  %1499 = vmatmul.mubr.bf16.gmra.mxu1 %v1655_v12 }
  0x35   : > { %1450 = vmatprep.mubr.msk.bf16.mxu0 %vm1697_vm0, %v1696_v1  ;;  %1502 = vmatprep.mubr.msk.bf16.mxu1 %vm1697_vm0, %v1696_v1 }
  0x36   : > { %1535 = vmatpush3.bf16.msra.mxu0 %v1646_v3  ;;  %1587 = vmatpush3.bf16.msra.mxu1 %v1646_v3 }
  0x37   : > { %1536 = vmatprep.subr.bf16.mxu0 %v1696_v1  ;;  %1588 = vmatprep.subr.bf16.mxu1 %v1696_v1 }
  0x3a   : > { %1537 = vmatpush3.bf16.msra.mxu0 %v1647_v4  ;;  %1589 = vmatpush3.bf16.msra.mxu1 %v1647_v4 }
  0x3b   : > { %1538 = vmatprep.subr.bf16.mxu0 %v1696_v1  ;;  %1590 = vmatprep.subr.bf16.mxu1 %v1696_v1 }
  0x3c   : > { %1451 = vmatmul.mubr.bf16.gmra.mxu0 %v1656_v13  ;;  %1503 = vmatmul.mubr.bf16.gmra.mxu1 %v1657_v14 }
  0x3d   : > { %1454 = vmatprep.mubr.msk.bf16.mxu0 %vm1697_vm0, %v1696_v1  ;;  %1506 = vmatprep.mubr.msk.bf16.mxu1 %vm1697_vm0, %v1696_v1 }
  0x3e   : > { %1539 = vmatpush3.bf16.msra.mxu0 %v1648_v5  ;;  %1591 = vmatpush3.bf16.msra.mxu1 %v1648_v5 }
  0x3f   : > { %1540 = vmatprep.subr.bf16.mxu0 %v1696_v1  ;;  %1592 = vmatprep.subr.bf16.mxu1 %v1696_v1 }
  0x42   : > { %1541 = vmatpush3.bf16.msra.mxu0 %v1649_v6  ;;  %1593 = vmatpush3.bf16.msra.mxu1 %v1649_v6 }
  0x43   : > { %1542 = vmatprep.subr.bf16.mxu0 %v1696_v1  ;;  %1594 = vmatprep.subr.bf16.mxu1 %v1696_v1 }
  0x44   : > { %1455 = vmatmul.mubr.bf16.gmra.mxu0 %v1658_v15  ;;  %1507 = vmatmul.mubr.bf16.gmra.mxu1 %v1659_v16 }
  0x45   : > { %1458 = vmatprep.mubr.msk.bf16.mxu0 %vm1697_vm0, %v1696_v1  ;;  %1510 = vmatprep.mubr.msk.bf16.mxu1 %vm1697_vm0, %v1696_v1 }
  0x46   : > { %1543 = vmatpush3.bf16.msra.mxu0 %v1650_v7  ;;  %1595 = vmatpush3.bf16.msra.mxu1 %v1650_v7 }
  0x47   : > { %1544 = vmatprep.subr.bf16.mxu0 %v1696_v1  ;;  %1596 = vmatprep.subr.bf16.mxu1 %v1696_v1 }
  0x4a   : > { %1545 = vmatpush3.bf16.msra.mxu0 %v1800_v8  ;;  %1597 = vmatpush3.bf16.msra.mxu1 %v1800_v8 }
  0x4c   : > { %1459 = vmatmul.mubr.bf16.gmra.mxu0 %v1660_v17  ;;  %1511 = vmatmul.mubr.bf16.gmra.mxu1 %v1661_v18 }
  0x4d   : > { %1462 = vmatprep.mubr.msk.bf16.mxu0 %vm1697_vm0, %v1696_v1  ;;  %1514 = vmatprep.mubr.msk.bf16.mxu1 %vm1697_vm0, %v1696_v1 }
  0x54   : > { %1463 = vmatmul.mubr.bf16.gmra.mxu0 %v1662_v19  ;;  %1515 = vmatmul.mubr.bf16.gmra.mxu1 %v1663_v20 }
  0x55   : > { %1466 = vmatprep.mubr.msk.bf16.mxu0 %vm1697_vm0, %v1696_v1  ;;  %1518 = vmatprep.mubr.msk.bf16.mxu1 %vm1697_vm0, %v1696_v1 }
  0x5c   : > { %1467 = vmatmul.mubr.bf16.gmra.mxu0 %v1664_v21  ;;  %1519 = vmatmul.mubr.bf16.gmra.mxu1 %v1665_v22 }
  0x5d   : > { %1470 = vmatprep.mubr.msk.bf16.mxu0 %vm1697_vm0, %v1696_v1  ;;  %1522 = vmatprep.mubr.msk.bf16.mxu1 %vm1697_vm0, %v1696_v1 }
  0x64   : > { %1471 = vmatmul.mubr.bf16.gmra.mxu0 %v1666_v23  ;;  %1523 = vmatmul.mubr.bf16.gmra.mxu1 %v1667_v24 }
  0x65   : > { %1474 = vmatprep.mubr.msk.bf16.mxu0 %vm1697_vm0, %v1696_v1  ;;  %1526 = vmatprep.mubr.msk.bf16.mxu1 %vm1697_vm0, %v1696_v1 }
  0x6c   : > { %1475 = vmatmul.mubr.bf16.gmra.mxu0 %v1668_v25  ;;  %1527 = vmatmul.mubr.bf16.gmra.mxu1 %v1669_v26 }
  0x6d   : > { %1546 = vmatprep.mubr.msk.bf16.mxu0 %vm1697_vm0, %v1696_v1  ;;  %1598 = vmatprep.mubr.msk.bf16.mxu1 %vm1697_vm0, %v1696_v1 }
  0x74   : > { %1547 = vmatmul.mubr.bf16.vlgmr.msra.gmra.mxu0 %v1670_v27  ;;  %1599 = vmatmul.mubr.bf16.vlgmr.msra.gmra.mxu1 %v1671_v28 }
  0x75   : > { %1550 = vmatprep.mubr.msk.bf16.mxu0 %vm1697_vm0, %v1696_v1  ;;  %1602 = vmatprep.mubr.msk.bf16.mxu1 %vm1697_vm0, %v1696_v1 }
  0x7c   : > { %1551 = vmatmul.mubr.bf16.gmra.mxu0 %v1672_v29  ;;  %1603 = vmatmul.mubr.bf16.gmra.mxu1 %v1673_v30 }
  0x7d   : > { %1554 = vmatprep.mubr.msk.bf16.mxu0 %vm1697_vm0, %v1696_v1  ;;  %1606 = vmatprep.mubr.msk.bf16.mxu1 %vm1697_vm0, %v1696_v1 }
  0x84   : > { %1555 = vmatmul.mubr.bf16.gmra.mxu0 %v1674_v31  ;;  %1607 = vmatmul.mubr.bf16.gmra.mxu1 %v1675_v32 }
  0x85   : > { %1558 = vmatprep.mubr.msk.bf16.mxu0 %vm1697_vm0, %v1696_v1  ;;  %1610 = vmatprep.mubr.msk.bf16.mxu1 %vm1697_vm0, %v1696_v1 }
  0x8c   : > { %1559 = vmatmul.mubr.bf16.gmra.mxu0 %v1676_v33  ;;  %1611 = vmatmul.mubr.bf16.gmra.mxu1 %v1677_v34 }
  0x8d   : > { %1562 = vmatprep.mubr.msk.bf16.mxu0 %vm1697_vm0, %v1696_v1  ;;  %1614 = vmatprep.mubr.msk.bf16.mxu1 %vm1697_vm0, %v1696_v1 }
  0x94   : > { %1563 = vmatmul.mubr.bf16.gmra.mxu0 %v1678_v35  ;;  %1615 = vmatmul.mubr.bf16.gmra.mxu1 %v1679_v36 }
  0x95   : > { %1566 = vmatprep.mubr.msk.bf16.mxu0 %vm1697_vm0, %v1696_v1  ;;  %1618 = vmatprep.mubr.msk.bf16.mxu1 %vm1697_vm0, %v1696_v1 }
  0x9c   : > { %1567 = vmatmul.mubr.bf16.gmra.mxu0 %v1680_v37  ;;  %1619 = vmatmul.mubr.bf16.gmra.mxu1 %v1681_v38 }
  0x9d   : > { %1570 = vmatprep.mubr.msk.bf16.mxu0 %vm1697_vm0, %v1696_v1  ;;  %1622 = vmatprep.mubr.msk.bf16.mxu1 %vm1697_vm0, %v1696_v1 }
  0xa4   : > { %1571 = vmatmul.mubr.bf16.gmra.mxu0 %v1682_v39  ;;  %1623 = vmatmul.mubr.bf16.gmra.mxu1 %v1683_v40 }
  0xa5   : > { %1574 = vmatprep.mubr.msk.bf16.mxu0 %vm1697_vm0, %v1696_v1  ;;  %1626 = vmatprep.mubr.msk.bf16.mxu1 %vm1697_vm0, %v1696_v1 }
  0xac   : > { %1575 = vmatmul.mubr.bf16.gmra.mxu0 %v1684_v41  ;;  %1627 = vmatmul.mubr.bf16.gmra.mxu1 %v1685_v42 }
  0xad   : > { %1578 = vmatprep.mubr.msk.bf16.mxu0 %vm1697_vm0, %v1696_v1  ;;  %1630 = vmatprep.mubr.msk.bf16.mxu1 %vm1697_vm0, %v1696_v1 }
  0xb4   : > { %1579 = vmatmul.mubr.bf16.gmra.mxu0 %v1686_v43  ;;  %1631 = vmatmul.mubr.bf16.gmra.mxu1 %v1687_v44 }
  0xec   : > { %v1940_v45 = vpop.f32.mrf.mxu0  ;;  %v1942_v46 = vpop.f32.mrf.mxu1 }
  0xed   : > { %v1094_v47 = vmax.f32 %v1940_v45, %v1942_v46 }
  0xee   : > { %v1444_v48 = vpop.f32.mrf.mxu0  ;;  %v1496_v49 = vpop.f32.mrf.mxu1 }
  0xf0   : > { %v1946_v50 = vpop.f32.mrf.mxu0  ;;  %v1948_v51 = vpop.f32.mrf.mxu1 }
  0xf1   : > { %v1095_v52 = vmax.f32 %v1946_v50, %v1948_v51 }
  0xf2   : > { %v1445_v53 = vpop.f32.mrf.mxu0  ;;  %v1497_v54 = vpop.f32.mrf.mxu1 }
  0xf4   : > { %v1952_v55 = vpop.f32.mrf.mxu0  ;;  %v1954_v56 = vpop.f32.mrf.mxu1 }
  0xf5   : > { %v1096_v57 = vmax.f32 %v1952_v55, %v1954_v56 }
  0xf6   : > { %v1448_v58 = vpop.f32.mrf.mxu0  ;;  %v1500_v59 = vpop.f32.mrf.mxu1 }
  0xf8   : > { %v1958_v60 = vpop.f32.mrf.mxu0  ;;  %v1960_v61 = vpop.f32.mrf.mxu1 }
  0xf9   : > { %v1097_v62 = vmax.f32 %v1958_v60, %v1960_v61 }
  0xfa   : > { %v1449_v63 = vpop.f32.mrf.mxu0  ;;  %v1501_v0 = vpop.f32.mrf.mxu1 }
  0xfc   : > { %v1964_v1 = vpop.f32.mrf.mxu0  ;;  %v1966_v2 = vpop.f32.mrf.mxu1 }
  0xfd   : > { %v1098_v3 = vmax.f32 %v1964_v1, %v1966_v2 }
  0xfe   : > { %v1452_v4 = vpop.f32.mrf.mxu0  ;;  %v1504_v5 = vpop.f32.mrf.mxu1 }
 0x100   : > { %v1970_v6 = vpop.f32.mrf.mxu0  ;;  %v1972_v7 = vpop.f32.mrf.mxu1 }
 0x101   : > { %v1099_v8 = vmax.f32 %v1970_v6, %v1972_v7 }
 0x102   : > { %v1453_v9 = vpop.f32.mrf.mxu0  ;;  %v1505_v10 = vpop.f32.mrf.mxu1 }
 0x104   : > { %v1976_v11 = vpop.f32.mrf.mxu0  ;;  %v1978_v12 = vpop.f32.mrf.mxu1 }
 0x105   : > { %v1100_v13 = vmax.f32 %v1976_v11, %v1978_v12 }
 0x106   : > { %v1456_v14 = vpop.f32.mrf.mxu0  ;;  %v1508_v15 = vpop.f32.mrf.mxu1 }
 0x108   : > { %v1982_v16 = vpop.f32.mrf.mxu0  ;;  %v1984_v17 = vpop.f32.mrf.mxu1 }
 0x109   : > { %v1101_v18 = vmax.f32 %v1982_v16, %v1984_v17 }
 0x10a   : > { %v1457_v19 = vpop.f32.mrf.mxu0  ;;  %v1509_v20 = vpop.f32.mrf.mxu1 }
 0x10c   : > { %v1988_v21 = vpop.f32.mrf.mxu0  ;;  %v1990_v22 = vpop.f32.mrf.mxu1 }
 0x10d   : > { %v1102_v23 = vmax.f32 %v1988_v21, %v1990_v22 }
 0x10e   : > { %v1460_v24 = vpop.f32.mrf.mxu0  ;;  %v1512_v25 = vpop.f32.mrf.mxu1 }
 0x110   : > { %v1994_v26 = vpop.f32.mrf.mxu0  ;;  %v1996_v27 = vpop.f32.mrf.mxu1 }
 0x111   : > { %v1103_v28 = vmax.f32 %v1994_v26, %v1996_v27 }
 0x112   : > { %v1461_v29 = vpop.f32.mrf.mxu0  ;;  %v1513_v30 = vpop.f32.mrf.mxu1 }
 0x114   : > { %v2000_v31 = vpop.f32.mrf.mxu0  ;;  %v2002_v32 = vpop.f32.mrf.mxu1 }
 0x115   : > { %v1104_v33 = vmax.f32 %v2000_v31, %v2002_v32 }
 0x116   : > { %v1464_v34 = vpop.f32.mrf.mxu0  ;;  %v1516_v35 = vpop.f32.mrf.mxu1 }
 0x118   : > { %v2006_v36 = vpop.f32.mrf.mxu0  ;;  %v2008_v37 = vpop.f32.mrf.mxu1 }
 0x119   : > { %v1105_v38 = vmax.f32 %v2006_v36, %v2008_v37 }
 0x11a   : > { %v1465_v39 = vpop.f32.mrf.mxu0  ;;  %v1517_v40 = vpop.f32.mrf.mxu1 }
 0x11c   : > { %v2012_v41 = vpop.f32.mrf.mxu0  ;;  %v2014_v42 = vpop.f32.mrf.mxu1 }
 0x11d   : > { %v1106_v43 = vmax.f32 %v2012_v41, %v2014_v42 }
 0x11e   : > { %v1468_v44 = vpop.f32.mrf.mxu0  ;;  %v1520_v48 = vpop.f32.mrf.mxu1 }
 0x120   : > { %v2018_v49 = vpop.f32.mrf.mxu0  ;;  %v2020_v53 = vpop.f32.mrf.mxu1 }
 0x121   : > { %v1107_v54 = vmax.f32 %v2018_v49, %v2020_v53 }
 0x122   : > { %v1469_v58 = vpop.f32.mrf.mxu0  ;;  %v1521_v59 = vpop.f32.mrf.mxu1 }
 0x124   : > { %v2024_v63 = vpop.f32.mrf.mxu0  ;;  %v2026_v0 = vpop.f32.mrf.mxu1 }
 0x125   : > { %v1108_v4 = vmax.f32 %v2024_v63, %v2026_v0 }
 0x126   : > { %v1472_v5 = vpop.f32.mrf.mxu0  ;;  %v1524_v9 = vpop.f32.mrf.mxu1 }
 0x127   : > { %v2051_v9 = vld [vmem:[%s2157_s5] ss:$0 sm:$0xff] }
 0x128   : > { %v2030_v10 = vpop.f32.mrf.mxu0  ;;  %v2032_v14 = vpop.f32.mrf.mxu1 }
 0x129   : > { %v1109_v15 = vmax.f32 %v2030_v10, %v2032_v14 }
 0x12a   : > { %v1473_v19 = vpop.f32.mrf.mxu0  ;;  %v1525_v20 = vpop.f32.mrf.mxu1 }
 0x12c   : > { %v2036_v24 = vpop.f32.mrf.mxu0  ;;  %v2038_v25 = vpop.f32.mrf.mxu1 }
 0x12e   : > { %v1476_v30 = vpop.f32.mrf.mxu0  ;;  %v1528_v34 = vpop.f32.mrf.mxu1 }
 0x130   : > { %v2042_v35 = vpop.f32.mrf.mxu0  ;;  %v2044_v39 = vpop.f32.mrf.mxu1 }
 0x131   : > { %v1111_v40 = vmax.f32 %v2042_v35, %v2044_v39 }
 0x132   : > { %v1477_v44 = vpop.f32.mrf.mxu0  ;;  %v1529_v48 = vpop.f32.mrf.mxu1 }
 0x134   : > { %v846_v58 = vpop.f32.mrf.mxu0  ;;  %v1023_v59 = vpop.f32.mrf.mxu1 }
 0x135   : > { %v1112_v5 = vmax.f32 %v846_v58, %v1023_v59 }
 0x136   : > { %v1548_v19 = vpop.f32.mrf.mxu0  ;;  %v1600_v20 = vpop.f32.mrf.mxu1 }
 0x137   : > { %v1130_v30 = vmax.f32 %v1094_v47, %v1112_v5 }
 0x138   : > { %v849_v34 = vpop.f32.mrf.mxu0  ;;  %v1026_v29 = vpop.f32.mrf.mxu1 }
 0x139   : > { %v1155_v44 = vadd.f32 %v2051_v9, %v1130_v30  ;;  %v1113_v48 = vmax.f32 %v849_v34, %v1026_v29 }
 0x13a   : > { %v1549_v58 = vpop.f32.mrf.mxu0  ;;  %v1601_v59 = vpop.f32.mrf.mxu1 }
 0x13b   : > { %v1173_v19 = vmax.f32 %v1155_v44, 0.0  ;;  %v1131_v45 = vmax.f32 %v1095_v52, %v1113_v48 }
 0x13c   : > { %v854_v46 = vpop.f32.mrf.mxu0  ;;  %v1031_v47 = vpop.f32.mrf.mxu1 }
 0x13d   : > { %1191 = vst [vmem:[%s2061_s12] sm:$0xff] %v1173_v19  ;;  %v1156_v5 = vadd.f32 %v2051_v9, %v1131_v45  ;;  %v1114_v29 = vmax.f32 %v854_v46, %v1031_v47 }
 0x13e   : > { %v1552_v20 = vpop.f32.mrf.mxu0  ;;  %v1604_v30 = vpop.f32.mrf.mxu1 }
 0x13f   : > { %v1174_v34 = vmax.f32 %v1156_v5, 0.0  ;;  %v1132_v58 = vmax.f32 %v1096_v57, %v1114_v29 }
 0x140   : > { %v857_v59 = vpop.f32.mrf.mxu0  ;;  %v1034_v44 = vpop.f32.mrf.mxu1 }
 0x141   : > { %1192 = vst [vmem:[%s2061_s12 + $0x8] sm:$0xff] %v1174_v34  ;;  %v1157_v50 = vadd.f32 %v2051_v9, %v1132_v58  ;;  %v1115_v51 = vmax.f32 %v857_v59, %v1034_v44 }
 0x142   : > { %v1553_v52 = vpop.f32.mrf.mxu0  ;;  %v1605_v48 = vpop.f32.mrf.mxu1 }
 0x143   : > { %v1175_v19 = vmax.f32 %v1157_v50, 0.0  ;;  %v1133_v45 = vmax.f32 %v1097_v62, %v1115_v51 }
 0x144   : > { %v862_v46 = vpop.f32.mrf.mxu0  ;;  %v1039_v47 = vpop.f32.mrf.mxu1 }
 0x145   : > { %1193 = vst [vmem:[%s2061_s12 + $0x10] sm:$0xff] %v1175_v19  ;;  %v1158_v55 = vadd.f32 %v2051_v9, %v1133_v45  ;;  %v1116_v56 = vmax.f32 %v862_v46, %v1039_v47 }
 0x146   : > { %v1556_v57 = vpop.f32.mrf.mxu0  ;;  %v1608_v5 = vpop.f32.mrf.mxu1 }
 0x147   : > { %v1176_v29 = vmax.f32 %v1158_v55, 0.0  ;;  %v1134_v20 = vmax.f32 %v1098_v3, %v1116_v56 }
 0x148   : > { %v865_v30 = vpop.f32.mrf.mxu0  ;;  %v1042_v34 = vpop.f32.mrf.mxu1 }
 0x149   : > { %1194 = vst [vmem:[%s2061_s12 + $0x18] sm:$0xff] %v1176_v29  ;;  %v1159_v60 = vadd.f32 %v2051_v9, %v1134_v20  ;;  %v1117_v61 = vmax.f32 %v865_v30, %v1042_v34 }
 0x14a   : > { %v1557_v62 = vpop.f32.mrf.mxu0  ;;  %v1609_v58 = vpop.f32.mrf.mxu1 }
 0x14b   : > { %v1177_v59 = vmax.f32 %v1159_v60, 0.0  ;;  %v1135_v44 = vmax.f32 %v1099_v8, %v1117_v61 }
 0x14c   : > { %v870_v50 = vpop.f32.mrf.mxu0  ;;  %v1047_v51 = vpop.f32.mrf.mxu1 }
 0x14d   : > { %1195 = vst [vmem:[%s2061_s12 + $0x20] sm:$0xff] %v1177_v59  ;;  %v1160_v1 = vadd.f32 %v2051_v9, %v1135_v44  ;;  %v1118_v2 = vmax.f32 %v870_v50, %v1047_v51 }
 0x14e   : > { %v1560_v3 = vpop.f32.mrf.mxu0  ;;  %v1612_v52 = vpop.f32.mrf.mxu1 }
 0x14f   : > { %v1178_v48 = vmax.f32 %v1160_v1, 0.0  ;;  %v1136_v19 = vmax.f32 %v1100_v13, %v1118_v2 }
 0x150   : > { %v873_v45 = vpop.f32.mrf.mxu0  ;;  %v1050_v46 = vpop.f32.mrf.mxu1 }
 0x151   : > { %1196 = vst [vmem:[%s2061_s12 + $0x28] sm:$0xff] %v1178_v48  ;;  %v1161_v6 = vadd.f32 %v2051_v9, %v1136_v19  ;;  %v1119_v7 = vmax.f32 %v873_v45, %v1050_v46 }
 0x152   : > { %v1561_v8 = vpop.f32.mrf.mxu0  ;;  %v1613_v47 = vpop.f32.mrf.mxu1 }
 0x153   : > { %v1179_v55 = vmax.f32 %v1161_v6, 0.0  ;;  %v1137_v56 = vmax.f32 %v1101_v18, %v1119_v7 }
 0x154   : > { %v878_v57 = vpop.f32.mrf.mxu0  ;;  %v1055_v5 = vpop.f32.mrf.mxu1 }
 0x155   : > { %1197 = vst [vmem:[%s2061_s12 + $0x30] sm:$0xff] %v1179_v55  ;;  %v1162_v11 = vadd.f32 %v2051_v9, %v1137_v56  ;;  %v1120_v12 = vmax.f32 %v878_v57, %v1055_v5 }
 0x156   : > { %v1564_v13 = vpop.f32.mrf.mxu0  ;;  %v1616_v29 = vpop.f32.mrf.mxu1 }
 0x157   : > { %v1180_v20 = vmax.f32 %v1162_v11, 0.0  ;;  %v1138_v30 = vmax.f32 %v1102_v23, %v1120_v12 }
 0x158   : > { %v881_v34 = vpop.f32.mrf.mxu0  ;;  %v1058_v60 = vpop.f32.mrf.mxu1 }
 0x159   : > { %1198 = vst [vmem:[%s2061_s12 + $0x38] sm:$0xff] %v1180_v20  ;;  %v1163_v16 = vadd.f32 %v2051_v9, %v1138_v30  ;;  %v1121_v17 = vmax.f32 %v881_v34, %v1058_v60 }
 0x15a   : > { %v1565_v18 = vpop.f32.mrf.mxu0  ;;  %v1617_v61 = vpop.f32.mrf.mxu1 }
 0x15b   : > { %v1181_v62 = vmax.f32 %v1163_v16, 0.0  ;;  %v1139_v58 = vmax.f32 %v1103_v28, %v1121_v17 }
 0x15c   : > { %v886_v59 = vpop.f32.mrf.mxu0  ;;  %v1063_v44 = vpop.f32.mrf.mxu1 }
 0x15d   : > { %1199 = vst [vmem:[%s2061_s12 + $0x40] sm:$0xff] %v1181_v62  ;;  %v1164_v21 = vadd.f32 %v2051_v9, %v1139_v58  ;;  %v1122_v22 = vmax.f32 %v886_v59, %v1063_v44  ;;  %v2159_v59 = vmax.f32 %v2036_v24, %v2038_v25 }
 0x15e   : > { %v1568_v23 = vpop.f32.mrf.mxu0  ;;  %v1620_v50 = vpop.f32.mrf.mxu1 }
 0x15f   : > { %v1182_v51 = vmax.f32 %v1164_v21, 0.0  ;;  %v1140_v1 = vmax.f32 %v1104_v33, %v1122_v22 }
 0x160   : > { %v889_v2 = vpop.f32.mrf.mxu0  ;;  %v1066_v3 = vpop.f32.mrf.mxu1 }
 0x161   : > { %1200 = vst [vmem:[%s2061_s12 + $0x48] sm:$0xff] %v1182_v51  ;;  %v1165_v26 = vadd.f32 %v2051_v9, %v1140_v1  ;;  %v1123_v27 = vmax.f32 %v889_v2, %v1066_v3 }
 0x162   : > { %v1569_v28 = vpop.f32.mrf.mxu0  ;;  %v1621_v52 = vpop.f32.mrf.mxu1 }
 0x163   : > { %v1183_v48 = vmax.f32 %v1165_v26, 0.0  ;;  %v1141_v19 = vmax.f32 %v1105_v38, %v1123_v27 }
 0x164   : > { %v894_v45 = vpop.f32.mrf.mxu0  ;;  %v1071_v46 = vpop.f32.mrf.mxu1 }
 0x165   : > { %1201 = vst [vmem:[%s2061_s12 + $0x50] sm:$0xff] %v1183_v48  ;;  %v1166_v31 = vadd.f32 %v2051_v9, %v1141_v19  ;;  %v1124_v32 = vmax.f32 %v894_v45, %v1071_v46 }
 0x166   : > { %v1572_v33 = vpop.f32.mrf.mxu0  ;;  %v1624_v6 = vpop.f32.mrf.mxu1 }
 0x167   : > { %v1184_v7 = vmax.f32 %v1166_v31, 0.0  ;;  %v1142_v8 = vmax.f32 %v1106_v43, %v1124_v32 }
 0x168   : > { %v897_v47 = vpop.f32.mrf.mxu0  ;;  %v1074_v55 = vpop.f32.mrf.mxu1 }
 0x169   : > { %1202 = vst [vmem:[%s2061_s12 + $0x58] sm:$0xff] %v1184_v7  ;;  %v1167_v36 = vadd.f32 %v2051_v9, %v1142_v8  ;;  %v1125_v37 = vmax.f32 %v897_v47, %v1074_v55 }
 0x16a   : > { %v1573_v38 = vpop.f32.mrf.mxu0  ;;  %v1625_v56 = vpop.f32.mrf.mxu1 }
 0x16b   : > { %v1185_v57 = vmax.f32 %v1167_v36, 0.0  ;;  %v1143_v5 = vmax.f32 %v1107_v54, %v1125_v37 }
 0x16c   : > { %v902_v11 = vpop.f32.mrf.mxu0  ;;  %v1079_v12 = vpop.f32.mrf.mxu1 }
 0x16d   : > { %1203 = vst [vmem:[%s2061_s12 + $0x60] sm:$0xff] %v1185_v57  ;;  %v1168_v41 = vadd.f32 %v2051_v9, %v1143_v5  ;;  %v1126_v42 = vmax.f32 %v902_v11, %v1079_v12 }
 0x16e   : > { %v1576_v43 = vpop.f32.mrf.mxu0  ;;  %v1628_v13 = vpop.f32.mrf.mxu1 }
 0x16f   : > { %v1186_v29 = vmax.f32 %v1168_v41, 0.0  ;;  %v1144_v20 = vmax.f32 %v1108_v4, %v1126_v42 }
 0x170   : > { %v905_v30 = vpop.f32.mrf.mxu0  ;;  %v1082_v34 = vpop.f32.mrf.mxu1 }
 0x171   : > { %1204 = vst [vmem:[%s2061_s12 + $0x68] sm:$0xff] %v1186_v29  ;;  %v1169_v49 = vadd.f32 %v2051_v9, %v1144_v20  ;;  %v1127_v53 = vmax.f32 %v905_v30, %v1082_v34 }
 0x172   : > { %v1577_v54 = vpop.f32.mrf.mxu0  ;;  %v1629_v60 = vpop.f32.mrf.mxu1 }
 0x173   : > { %v1187_v16 = vmax.f32 %v1169_v49, 0.0  ;;  %v1145_v17 = vmax.f32 %v1109_v15, %v1127_v53 }
 0x174   : > { %v910_v18 = vpop.f32.mrf.mxu0  ;;  %v1087_v61 = vpop.f32.mrf.mxu1 }
 0x175   : > { %1205 = vst [vmem:[%s2061_s12 + $0x70] sm:$0xff] %v1187_v16  ;;  %v1170_v63 = vadd.f32 %v2051_v9, %v1145_v17  ;;  %v1128_v0 = vmax.f32 %v910_v18, %v1087_v61 }
 0x176   : > { %v1580_v4 = vpop.f32.mrf.mxu0  ;;  %v1632_v62 = vpop.f32.mrf.mxu1 }
 0x177   : > { %v1188_v58 = vmax.f32 %v1170_v63, 0.0  ;;  %v1146_v44 = vmax.f32 %v2159_v59, %v1128_v0 }
 0x178   : > { %v913_v21 = vpop.f32.mrf.mxu0  ;;  %v1090_v22 = vpop.f32.mrf.mxu1 }
 0x179   : > { %1206 = vst [vmem:[%s2061_s12 + $0x78] sm:$0xff] %v1188_v58  ;;  %v1171_v10 = vadd.f32 %v2051_v9, %v1146_v44  ;;  %v1129_v14 = vmax.f32 %v913_v21, %v1090_v22 }
 0x17a   : > { %v1581_v15 = vpop.f32.mrf.mxu0  ;;  %v1633_v23 = vpop.f32.mrf.mxu1 }
 0x17b   : > { %v1189_v50 = vmax.f32 %v1171_v10, 0.0  ;;  %v1147_v51 = vmax.f32 %v1111_v40, %v1129_v14 }
 0x17d   : > { %1207 = vst [vmem:[%s2061_s12 + $0x80] sm:$0xff] %v1189_v50  ;;  %v1172_v1 = vadd.f32 %v2051_v9, %v1147_v51 }
 0x17f   : > { %v1190_v2 = vmax.f32 %v1172_v1, 0.0 }
 0x181   : > { %1208 = vst [vmem:[%s2061_s12 + $0x88] sm:$0xff] %v1190_v2 }
 0x182 PF: > { %s16_s21 = sadd.s32 1, %s1694_s21  }
 0x183   : > { %p13_p4 = scmp.ge.s32.totalorder %s16_s21, 4  }
 0x185   :  { %15 = sbr.rel (!%p13_p4) target bundleno = 1 (0x1), region = 83 }

// kernel: cnn_mnist_forward.4
= control target key start
LH: loop header
LB: loop body
LE: loop exit
PB: predicated region body
PF: predicated region fallthrough
CT: control target
= control target key end

     0   :  { %s858_s4 = inlined_call_operand.vmem [shape: bf16[256,128], index: 4, kind: input, shape index: {}]   ;;  %s859_s0 = inlined_call_operand.vmem [shape: bf16[32,256], index: 0, kind: input, shape index: {}]   ;;  %s860_s1 = inlined_call_operand.vmem [shape: bf16[32,256], index: 1, kind: input, shape index: {}]   ;;  %s861_s2 = inlined_call_operand.vmem [shape: bf16[32,256], index: 2, kind: input, shape index: {}]   ;;  %s862_s3 = inlined_call_operand.vmem [shape: bf16[32,256], index: 3, kind: input, shape index: {}]   ;;  %s863_s5 = inlined_call_operand.vmem [shape: f32[1,128], index: 5, kind: input, shape index: {}]   ;;  %s864_s6 = inlined_call_operand.vmem [shape: f32[32,128], index: 6, kind: output, shape index: {}]  }
   0x1   :  { %v624_v0 = vld [vmem:[%s858_s4 + $0x78] sm:$0xff]   ;;  %v626_v2 = vld [vmem:[%s858_s4 + $0x70] sm:$0xff]   ;;  %v720_v4 = vld [vmem:[%s858_s4 + $0x68] sm:$0xff]  }
   0x2   :  { %v705_v1 = vld [vmem:[%s858_s4 + $0x38] sm:$0xff]   ;;  %512 = vmatprep.subr.bf16.mxu0 %v624_v0  ;;  %540 = vmatprep.subr.bf16.mxu1 %v624_v0  ;;  %v715_v3 = vld [vmem:[%s858_s4 + $0x30] sm:$0xff]   ;;  %v727_v5 = vld [vmem:[%s858_s4 + $0x28] sm:$0xff]  }
   0x3   :  { %513 = vmatpush3.bf16.msra.mxu0 %v705_v1  ;;  %541 = vmatpush3.bf16.msra.mxu1 %v705_v1  ;;  %v734_v6 = vld [vmem:[%s858_s4 + $0x60] sm:$0xff]   ;;  %v748_v8 = vld [vmem:[%s858_s4 + $0x58] sm:$0xff]   ;;  %v634_v10 = vld [vmem:[%s858_s4 + $0x50] sm:$0xff]  }
   0x4   :  { %514 = vmatprep.subr.bf16.mxu0 %v626_v2  ;;  %542 = vmatprep.subr.bf16.mxu1 %v626_v2  ;;  %v741_v7 = vld [vmem:[%s858_s4 + $0x20] sm:$0xff]   ;;  %v755_v9 = vld [vmem:[%s858_s4 + $0x18] sm:$0xff]   ;;  %v635_v13 = vld [vmem:[%s858_s4 + $0x10] sm:$0xff]  }
   0x5   :  { %v642_v11 = vld [vmem:[%s859_s0 + $0x4] ss:$8 sps:$4 sm:$0xff]   ;;  %v640_v18 = vld [vmem:[%s859_s0] ss:$8 sps:$4 sm:$0xff]   ;;  %v646_v20 = vld [vmem:[%s859_s0 + $0x14] ss:$8 sps:$4 sm:$0xff]  }
   0x6   :  { %v645_v12 = vld [vmem:[%s860_s1 + $0x4] ss:$8 sps:$4 sm:$0xff]   ;;  %208 = vmatprep.mubr.bf16.mxu0 %v642_v11  ;;  %v643_v19 = vld [vmem:[%s860_s1] ss:$8 sps:$4 sm:$0xff]   ;;  %v648_v21 = vld [vmem:[%s860_s1 + $0x14] ss:$8 sps:$4 sm:$0xff]  }
   0x7   :  { %515 = vmatpush3.bf16.msra.mxu0 %v715_v3  ;;  %543 = vmatpush3.bf16.msra.mxu1 %v715_v3  ;;  %v636_v14 = vld [vmem:[%s858_s4 + $0x48] sm:$0xff]   ;;  %v638_v16 = vld [vmem:[%s858_s4 + $0x40] sm:$0xff]   ;;  %v650_v22 = vld [vmem:[%s859_s0 + $0x10] ss:$8 sps:$4 sm:$0xff]  }
   0x8   :  { %516 = vmatprep.subr.bf16.mxu0 %v720_v4  ;;  %544 = vmatprep.subr.bf16.mxu1 %v720_v4  ;;  %v637_v15 = vld [vmem:[%s858_s4 + $0x8] sm:$0xff]   ;;  %v639_v17 = vld [vmem:[%s858_s4] sm:$0xff]   ;;  %v651_v23 = vld [vmem:[%s860_s1 + $0x10] ss:$8 sps:$4 sm:$0xff]  }
   0x9   :  { %281 = vmatprep.mubr.bf16.mxu1 %v645_v12  ;;  %v654_v24 = vld [vmem:[%s861_s2 + $0x4] ss:$8 sps:$4 sm:$0xff]   ;;  %v652_v26 = vld [vmem:[%s861_s2] ss:$8 sps:$4 sm:$0xff]   ;;  %v658_v28 = vld [vmem:[%s861_s2 + $0x14] ss:$8 sps:$4 sm:$0xff]  }
   0xa   :  { %v657_v25 = vld [vmem:[%s862_s3 + $0x4] ss:$8 sps:$4 sm:$0xff]   ;;  %v655_v27 = vld [vmem:[%s862_s3] ss:$8 sps:$4 sm:$0xff]   ;;  %v660_v29 = vld [vmem:[%s862_s3 + $0x14] ss:$8 sps:$4 sm:$0xff]  }
   0xb   :  { %517 = vmatpush3.bf16.msra.mxu0 %v727_v5  ;;  %545 = vmatpush3.bf16.msra.mxu1 %v727_v5  ;;  %v662_v30 = vld [vmem:[%s861_s2 + $0x10] ss:$8 sps:$4 sm:$0xff]   ;;  %v511_v62 = vld [vmem:[%s863_s5] ss:$0 sm:$0xff] }
   0xc   :  { %518 = vmatprep.subr.bf16.mxu0 %v734_v6  ;;  %546 = vmatprep.subr.bf16.mxu1 %v734_v6  ;;  %v663_v31 = vld [vmem:[%s862_s3 + $0x10] ss:$8 sps:$4 sm:$0xff]  }
   0xf   :  { %519 = vmatpush3.bf16.msra.mxu0 %v741_v7  ;;  %547 = vmatpush3.bf16.msra.mxu1 %v741_v7 }
  0x10   :  { %520 = vmatprep.subr.bf16.mxu0 %v748_v8  ;;  %548 = vmatprep.subr.bf16.mxu1 %v748_v8 }
  0x13   :  { %521 = vmatpush3.bf16.msra.mxu0 %v755_v9  ;;  %549 = vmatpush3.bf16.msra.mxu1 %v755_v9 }
  0x14   :  { %522 = vmatprep.subr.bf16.mxu0 %v634_v10  ;;  %550 = vmatprep.subr.bf16.mxu1 %v634_v10 }
  0x17   :  { %523 = vmatpush3.bf16.msra.mxu0 %v635_v13  ;;  %551 = vmatpush3.bf16.msra.mxu1 %v635_v13 }
  0x18   :  { %524 = vmatprep.subr.bf16.mxu0 %v636_v14  ;;  %552 = vmatprep.subr.bf16.mxu1 %v636_v14 }
  0x1b   :  { %525 = vmatpush3.bf16.msra.mxu0 %v637_v15  ;;  %553 = vmatpush3.bf16.msra.mxu1 %v637_v15 }
  0x1c   :  { %526 = vmatprep.subr.bf16.mxu0 %v638_v16  ;;  %554 = vmatprep.subr.bf16.mxu1 %v638_v16 }
  0x1f   :  { %527 = vmatpush3.bf16.msra.mxu0 %v639_v17  ;;  %555 = vmatpush3.bf16.msra.mxu1 %v639_v17 }
  0x20   :  { %568 = vmatprep.subr.bf16.mxu0 %v624_v0  ;;  %596 = vmatprep.subr.bf16.mxu1 %v624_v0 }
  0x22   :  { %209 = vmatmul.mubr.bf16.vlgmr.msra.gmra.mxu0 %v640_v18  ;;  %282 = vmatmul.mubr.bf16.vlgmr.msra.gmra.mxu1 %v643_v19 }
  0x23   :  { %569 = vmatpush3.bf16.msra.mxu0 %v705_v1  ;;  %597 = vmatpush3.bf16.msra.mxu1 %v705_v1 }
  0x24   :  { %570 = vmatprep.subr.bf16.mxu0 %v626_v2  ;;  %598 = vmatprep.subr.bf16.mxu1 %v626_v2 }
  0x25   :  { %216 = vmatprep.mubr.bf16.mxu0 %v646_v20  ;;  %289 = vmatprep.mubr.bf16.mxu1 %v648_v21 }
  0x27   :  { %571 = vmatpush3.bf16.msra.mxu0 %v715_v3  ;;  %599 = vmatpush3.bf16.msra.mxu1 %v715_v3 }
  0x28   :  { %572 = vmatprep.subr.bf16.mxu0 %v720_v4  ;;  %600 = vmatprep.subr.bf16.mxu1 %v720_v4 }
  0x2a   :  { %217 = vmatmul.mubr.bf16.gmra.mxu0 %v650_v22  ;;  %290 = vmatmul.mubr.bf16.gmra.mxu1 %v651_v23 }
  0x2b   :  { %573 = vmatpush3.bf16.msra.mxu0 %v727_v5  ;;  %601 = vmatpush3.bf16.msra.mxu1 %v727_v5 }
  0x2c   :  { %574 = vmatprep.subr.bf16.mxu0 %v734_v6  ;;  %602 = vmatprep.subr.bf16.mxu1 %v734_v6 }
  0x2d   :  { %354 = vmatprep.mubr.bf16.mxu0 %v654_v24  ;;  %427 = vmatprep.mubr.bf16.mxu1 %v657_v25 }
  0x2f   :  { %575 = vmatpush3.bf16.msra.mxu0 %v741_v7  ;;  %603 = vmatpush3.bf16.msra.mxu1 %v741_v7 }
  0x30   :  { %576 = vmatprep.subr.bf16.mxu0 %v748_v8  ;;  %604 = vmatprep.subr.bf16.mxu1 %v748_v8 }
  0x33   :  { %577 = vmatpush3.bf16.msra.mxu0 %v755_v9  ;;  %605 = vmatpush3.bf16.msra.mxu1 %v755_v9 }
  0x34   :  { %578 = vmatprep.subr.bf16.mxu0 %v634_v10  ;;  %606 = vmatprep.subr.bf16.mxu1 %v634_v10 }
  0x37   :  { %579 = vmatpush3.bf16.msra.mxu0 %v635_v13  ;;  %607 = vmatpush3.bf16.msra.mxu1 %v635_v13 }
  0x38   :  { %580 = vmatprep.subr.bf16.mxu0 %v636_v14  ;;  %608 = vmatprep.subr.bf16.mxu1 %v636_v14 }
  0x3b   :  { %581 = vmatpush3.bf16.msra.mxu0 %v637_v15  ;;  %609 = vmatpush3.bf16.msra.mxu1 %v637_v15 }
  0x3c   :  { %582 = vmatprep.subr.bf16.mxu0 %v638_v16  ;;  %610 = vmatprep.subr.bf16.mxu1 %v638_v16 }
  0x3f   :  { %583 = vmatpush3.bf16.msra.mxu0 %v639_v17  ;;  %611 = vmatpush3.bf16.msra.mxu1 %v639_v17 }
  0x42   :  { %355 = vmatmul.mubr.bf16.vlgmr.msra.gmra.mxu0 %v652_v26  ;;  %428 = vmatmul.mubr.bf16.vlgmr.msra.gmra.mxu1 %v655_v27 }
  0x43   :  { %362 = vmatprep.mubr.bf16.mxu0 %v658_v28  ;;  %435 = vmatprep.mubr.bf16.mxu1 %v660_v29 }
  0x4a   :  { %363 = vmatmul.mubr.bf16.gmra.mxu0 %v662_v30  ;;  %436 = vmatmul.mubr.bf16.gmra.mxu1 %v663_v31 }
  0xe2   :  { %v528_v32 = vpop.f32.mrf.mxu0  ;;  %v556_v33 = vpop.f32.mrf.mxu1 }
  0xe4   :  { %v529_v34 = vpop.f32.mrf.mxu0  ;;  %v557_v35 = vpop.f32.mrf.mxu1 }
  0xe5   :  { %v530_v50 = vadd.f32 %v529_v34, %v528_v32  ;;  %v558_v51 = vadd.f32 %v557_v35, %v556_v33 }
  0xe6   :  { %v531_v36 = vpop.f32.mrf.mxu0  ;;  %v559_v37 = vpop.f32.mrf.mxu1 }
  0xe7   :  { %v444_v58 = vmax.f32 %v530_v50, %v558_v51 }
  0xe8   :  { %v532_v38 = vpop.f32.mrf.mxu0  ;;  %v560_v39 = vpop.f32.mrf.mxu1 }
  0xe9   :  { %v533_v59 = vadd.f32 %v532_v38, %v531_v36  ;;  %v561_v60 = vadd.f32 %v560_v39, %v559_v37 }
  0xea   :  { %v534_v40 = vpop.f32.mrf.mxu0  ;;  %v562_v41 = vpop.f32.mrf.mxu1 }
  0xeb   :  { %v445_v8 = vmax.f32 %v533_v59, %v561_v60 }
  0xec   :  { %v535_v42 = vpop.f32.mrf.mxu0  ;;  %v563_v43 = vpop.f32.mrf.mxu1 }
  0xed   :  { %v536_v4 = vadd.f32 %v535_v42, %v534_v40  ;;  %v564_v5 = vadd.f32 %v563_v43, %v562_v41 }
  0xee   :  { %v537_v44 = vpop.f32.mrf.mxu0  ;;  %v565_v45 = vpop.f32.mrf.mxu1 }
  0xef   :  { %v446_v17 = vmax.f32 %v536_v4, %v564_v5 }
  0xf0   :  { %v538_v46 = vpop.f32.mrf.mxu0  ;;  %v566_v47 = vpop.f32.mrf.mxu1 }
  0xf1   :  { %v539_v20 = vadd.f32 %v538_v46, %v537_v44  ;;  %v567_v21 = vadd.f32 %v566_v47, %v565_v45 }
  0xf3   :  { %v447_v30 = vmax.f32 %v539_v20, %v567_v21 }
 0x102   :  { %v584_v48 = vpop.f32.mrf.mxu0  ;;  %v612_v49 = vpop.f32.mrf.mxu1 }
 0x104   :  { %v585_v52 = vpop.f32.mrf.mxu0  ;;  %v613_v53 = vpop.f32.mrf.mxu1 }
 0x105   :  { %v586_v54 = vadd.f32 %v585_v52, %v584_v48  ;;  %v614_v55 = vadd.f32 %v613_v53, %v612_v49 }
 0x106   :  { %v587_v56 = vpop.f32.mrf.mxu0  ;;  %v615_v57 = vpop.f32.mrf.mxu1 }
 0x107   :  { %v448_v61 = vmax.f32 %v586_v54, %v614_v55 }
 0x108   :  { %v588_v63 = vpop.f32.mrf.mxu0  ;;  %v616_v0 = vpop.f32.mrf.mxu1 }
 0x109   :  { %v452_v1 = vmax.f32 %v444_v58, %v448_v61  ;;  %v589_v2 = vadd.f32 %v588_v63, %v587_v56  ;;  %v617_v3 = vadd.f32 %v616_v0, %v615_v57 }
 0x10a   :  { %v590_v6 = vpop.f32.mrf.mxu0  ;;  %v618_v7 = vpop.f32.mrf.mxu1 }
 0x10b   :  { %v463_v9 = vadd.f32 %v511_v62, %v452_v1  ;;  %v449_v10 = vmax.f32 %v589_v2, %v617_v3 }
 0x10c   :  { %v591_v11 = vpop.f32.mrf.mxu0  ;;  %v619_v12 = vpop.f32.mrf.mxu1 }
 0x10d   :  { %v467_v13 = vmax.f32 %v463_v9, 0.0  ;;  %v453_v14 = vmax.f32 %v445_v8, %v449_v10  ;;  %v592_v15 = vadd.f32 %v591_v11, %v590_v6  ;;  %v620_v16 = vadd.f32 %v619_v12, %v618_v7 }
 0x10e   :  { %v593_v18 = vpop.f32.mrf.mxu0  ;;  %v621_v19 = vpop.f32.mrf.mxu1 }
 0x10f   :  { %471 = vst [vmem:[%s864_s6] sm:$0xff] %v467_v13  ;;  %v464_v22 = vadd.f32 %v511_v62, %v453_v14  ;;  %v450_v23 = vmax.f32 %v592_v15, %v620_v16 }
 0x110   :  { %v594_v24 = vpop.f32.mrf.mxu0  ;;  %v622_v25 = vpop.f32.mrf.mxu1 }
 0x111   :  { %v468_v26 = vmax.f32 %v464_v22, 0.0  ;;  %v454_v27 = vmax.f32 %v446_v17, %v450_v23  ;;  %v595_v28 = vadd.f32 %v594_v24, %v593_v18  ;;  %v623_v29 = vadd.f32 %v622_v25, %v621_v19 }
 0x113   :  { %472 = vst [vmem:[%s864_s6 + $0x8] sm:$0xff] %v468_v26  ;;  %v465_v31 = vadd.f32 %v511_v62, %v454_v27  ;;  %v451_v32 = vmax.f32 %v595_v28, %v623_v29 }
 0x115   :  { %v469_v33 = vmax.f32 %v465_v31, 0.0  ;;  %v455_v34 = vmax.f32 %v447_v30, %v451_v32 }
 0x117   :  { %473 = vst [vmem:[%s864_s6 + $0x10] sm:$0xff] %v469_v33  ;;  %v466_v35 = vadd.f32 %v511_v62, %v455_v34 }
 0x119   :  { %v470_v36 = vmax.f32 %v466_v35, 0.0 }
 0x11b   :  { %474 = vst [vmem:[%s864_s6 + $0x18] sm:$0xff] %v470_v36 }

// kernel: cnn_mnist_forward.5
= control target key start
LH: loop header
LB: loop body
LE: loop exit
PB: predicated region body
PF: predicated region fallthrough
CT: control target
= control target key end

     0   :  { %v604_v1 = vmov 0.0   ;;  %vm605_vm0 = vmmov 0   ;;  %v426_v51 = vlaneseq  ;;  %s767_s1 = inlined_call_operand.vmem [shape: bf16[384,128], index: 1, kind: input, shape index: {}]   ;;  %s768_s0 = inlined_call_operand.vmem [shape: bf16[8,384], index: 0, kind: input, shape index: {}]   ;;  %s769_s3 = inlined_call_operand.vmem [shape: bf16[128,128], index: 3, kind: input, shape index: {}]   ;;  %s770_s2 = inlined_call_operand.vmem [shape: f32[1,128], index: 2, kind: input, shape index: {}]   ;;  %s771_s4 = inlined_call_operand.vmem [shape: f32[1,128], index: 4, kind: input, shape index: {}]   ;;  %s772_s5 = inlined_call_operand.vmem [shape: f32[8,128], index: 5, kind: output, shape index: {}]  }
   0x1   :  { %v565_v0 = vld [vmem:[%s767_s1 + $0x78] sm:$0xff]   ;;  %523 = vmatprep.subr.bf16.mxu1 %v604_v1  ;;  %539 = vmatprep.mubr.msk.bf16.mxu1 %vm605_vm0, %v604_v1  ;;  %v568_v4 = vld [vmem:[%s767_s1 + $0x70] sm:$0xff]   ;;  %v571_v7 = vld [vmem:[%s767_s1 + $0x68] sm:$0xff]  }
   0x2   :  { %v566_v2 = vld [vmem:[%s767_s1 + $0x38] sm:$0xff]   ;;  %483 = vmatprep.subr.bf16.mxu0 %v565_v0  ;;  %v569_v5 = vld [vmem:[%s767_s1 + $0x30] sm:$0xff]   ;;  %v572_v8 = vld [vmem:[%s767_s1 + $0x28] sm:$0xff]   ;;  %v427_v52 = vand.u32 127, %v426_v51 }
   0x3   :  { %v567_v3 = vld [vmem:[%s767_s1 + $0xb8] sm:$0xff]   ;;  %484 = vmatpush3.bf16.msra.mxu0 %v566_v2  ;;  %v570_v6 = vld [vmem:[%s767_s1 + $0xb0] sm:$0xff]   ;;  %v573_v9 = vld [vmem:[%s767_s1 + $0xa8] sm:$0xff]  }
   0x4   :  { %524 = vmatpush3.bf16.msra.mxu1 %v567_v3  ;;  %485 = vmatprep.subr.bf16.mxu0 %v568_v4  ;;  %v574_v10 = vld [vmem:[%s767_s1 + $0x60] sm:$0xff]   ;;  %v577_v13 = vld [vmem:[%s767_s1 + $0x58] sm:$0xff]   ;;  %v580_v16 = vld [vmem:[%s767_s1 + $0x50] sm:$0xff]   ;;  %vm428_vm1 = vcmp.lt.s32.totalorder %v427_v52, 10 }
   0x5   :  { %525 = vmatprep.subr.bf16.mxu1 %v604_v1  ;;  %v575_v11 = vld [vmem:[%s767_s1 + $0x20] sm:$0xff]   ;;  %v578_v14 = vld [vmem:[%s767_s1 + $0x18] sm:$0xff]   ;;  %v581_v17 = vld [vmem:[%s767_s1 + $0x10] sm:$0xff]  }
   0x6   :  { %v576_v12 = vld [vmem:[%s767_s1 + $0xa0] sm:$0xff]   ;;  %v579_v15 = vld [vmem:[%s767_s1 + $0x98] sm:$0xff]   ;;  %v582_v18 = vld [vmem:[%s767_s1 + $0x90] sm:$0xff]  }
   0x7   :  { %486 = vmatpush3.bf16.msra.mxu0 %v569_v5  ;;  %v583_v19 = vld [vmem:[%s767_s1 + $0x48] sm:$0xff]   ;;  %v586_v22 = vld [vmem:[%s767_s1 + $0x40] sm:$0xff]   ;;  %v592_v28 = vld [vmem:[%s769_s3 + $0x38] sm:$0xff]  }
   0x8   :  { %526 = vmatpush3.bf16.msra.mxu1 %v570_v6  ;;  %487 = vmatprep.subr.bf16.mxu0 %v571_v7  ;;  %v584_v20 = vld [vmem:[%s767_s1 + $0x8] sm:$0xff]   ;;  %v21_v23 = vld [vmem:[%s768_s0] sm:$0xff]  ;;  %v593_v30 = vld [vmem:[%s769_s3 + $0x30] sm:$0xff]  }
   0x9   :  { %527 = vmatprep.subr.bf16.mxu1 %v604_v1  ;;  %v585_v21 = vld [vmem:[%s767_s1 + $0x88] sm:$0xff]   ;;  %v448_v24 = vcombine.high %v21_v23, %v21_v23  ;;  %v587_v25 = vld [vmem:[%s767_s1] sm:$0xff]   ;;  %v447_v29 = vcombine.low %v21_v23, %v21_v23  ;;  %v596_v33 = vld [vmem:[%s769_s3 + $0x18] sm:$0xff]  }
   0xa   :  { %v588_v26 = vld [vmem:[%s767_s1 + $0x80] sm:$0xff]   ;;  %v591_v27 = vld [vmem:[%s768_s0 + $0x8] ss:$0 sps:$4 sm:$0xff]   ;;  %v597_v34 = vld [vmem:[%s769_s3 + $0x10] sm:$0xff]  }
   0xb   :  { %488 = vmatpush3.bf16.msra.mxu0 %v572_v8  ;;  %265 = vmatprep.mubr.bf16.mxu0 %v448_v24  ;;  %v594_v31 = vld [vmem:[%s769_s3 + $0x28] sm:$0xff]   ;;  %v595_v32 = vld [vmem:[%s769_s3 + $0x20] sm:$0xff]  }
   0xc   :  { %528 = vmatpush3.bf16.msra.mxu1 %v573_v9  ;;  %489 = vmatprep.subr.bf16.mxu0 %v574_v10  ;;  %v598_v35 = vld [vmem:[%s769_s3 + $0x8] sm:$0xff]   ;;  %v599_v36 = vld [vmem:[%s769_s3] sm:$0xff]  }
   0xd   :  { %529 = vmatprep.subr.bf16.mxu1 %v604_v1  ;;  %v446_v39 = vld [vmem:[%s770_s2] ss:$0 sm:$0xff] }
   0xe   :  { %v474_v53 = vld [vmem:[%s771_s4] ss:$0 sm:$0xff] }
   0xf   :  { %490 = vmatpush3.bf16.msra.mxu0 %v575_v11 }
  0x10   :  { %530 = vmatpush3.bf16.msra.mxu1 %v576_v12  ;;  %491 = vmatprep.subr.bf16.mxu0 %v577_v13 }
  0x11   :  { %531 = vmatprep.subr.bf16.mxu1 %v604_v1 }
  0x13   :  { %492 = vmatpush3.bf16.msra.mxu0 %v578_v14 }
  0x14   :  { %532 = vmatpush3.bf16.msra.mxu1 %v579_v15  ;;  %493 = vmatprep.subr.bf16.mxu0 %v580_v16 }
  0x15   :  { %533 = vmatprep.subr.bf16.mxu1 %v604_v1 }
  0x17   :  { %494 = vmatpush3.bf16.msra.mxu0 %v581_v17 }
  0x18   :  { %534 = vmatpush3.bf16.msra.mxu1 %v582_v18  ;;  %495 = vmatprep.subr.bf16.mxu0 %v583_v19 }
  0x19   :  { %535 = vmatprep.subr.bf16.mxu1 %v604_v1 }
  0x1b   :  { %496 = vmatpush3.bf16.msra.mxu0 %v584_v20 }
  0x1c   :  { %536 = vmatpush3.bf16.msra.mxu1 %v585_v21  ;;  %497 = vmatprep.subr.bf16.mxu0 %v586_v22 }
  0x1d   :  { %537 = vmatprep.subr.bf16.mxu1 %v604_v1 }
  0x1f   :  { %498 = vmatpush3.bf16.msra.mxu0 %v587_v25 }
  0x20   :  { %538 = vmatpush3.bf16.msra.mxu1 %v588_v26  ;;  %543 = vmatprep.subr.bf16.mxu0 %v604_v1 }
  0x22   :  { %266 = vmatmul.mubr.bf16.vlgmr.msra.gmra.mxu0 %v447_v29 }
  0x23   :  { %540 = vmatmul.mubr.bf16.vlgmr.msra.gmra.mxu1 %v591_v27  ;;  %544 = vmatpush3.bf16.msra.mxu0 %v592_v28 }
  0x24   :  { %545 = vmatprep.subr.bf16.mxu0 %v604_v1  ;;  %559 = vmatprep.mubr.msk.bf16.mxu0 %vm605_vm0, %v604_v1 }
  0x27   :  { %546 = vmatpush3.bf16.msra.mxu0 %v593_v30 }
  0x28   :  { %547 = vmatprep.subr.bf16.mxu0 %v604_v1 }
  0x2b   :  { %548 = vmatpush3.bf16.msra.mxu0 %v594_v31 }
  0x2c   :  { %549 = vmatprep.subr.bf16.mxu0 %v604_v1 }
  0x2f   :  { %550 = vmatpush3.bf16.msra.mxu0 %v595_v32 }
  0x30   :  { %551 = vmatprep.subr.bf16.mxu0 %v604_v1 }
  0x33   :  { %552 = vmatpush3.bf16.msra.mxu0 %v596_v33 }
  0x34   :  { %553 = vmatprep.subr.bf16.mxu0 %v604_v1 }
  0x37   :  { %554 = vmatpush3.bf16.msra.mxu0 %v597_v34 }
  0x38   :  { %555 = vmatprep.subr.bf16.mxu0 %v604_v1 }
  0x3b   :  { %556 = vmatpush3.bf16.msra.mxu0 %v598_v35 }
  0x3c   :  { %557 = vmatprep.subr.bf16.mxu0 %v604_v1 }
  0x3f   :  { %558 = vmatpush3.bf16.msra.mxu0 %v599_v36 }
  0xe2   :  { %v499_v37 = vpop.f32.mrf.mxu0 }
  0xe3   :  { %v307_v38 = vpop.f32.mrf.mxu1 }
  0xe4   :  { %v500_v40 = vpop.f32.mrf.mxu0 }
  0xe5   :  { %v501_v41 = vadd.f32 %v500_v40, %v499_v37  ;;  %v541_v42 = vpop.f32.mrf.mxu1 }
  0xe6   :  { %v502_v43 = vpop.f32.mrf.mxu0 }
  0xe7   :  { %v268_v44 = vadd.f32 %v501_v41, %v446_v39  ;;  %v310_v45 = vpop.f32.mrf.mxu1 }
  0xe8   :  { %v503_v46 = vpop.f32.mrf.mxu0 }
  0xe9   :  { %v308_v47 = vadd.f32 %v307_v38, %v268_v44  ;;  %v542_v48 = vpop.f32.mrf.mxu1 }
  0xeb   :  { %v313_v49 = vmax.f32 %v308_v47, 0.0 }
  0xed   :  { %v314_v50 = vpack.c.bf16 %v313_v49, %v313_v49 }
  0xef   :  { %560 = vmatmul.mubr.bf16.vlgmr.msra.gmra.mxu0 %v314_v50 }
 0x1af   :  { %v420_v54 = vpop.f32.mrf.mxu0 }
 0x1b0   :  { %v421_v55 = vadd.f32 %v474_v53, %v420_v54 }
 0x1b1   :  { %v561_v56 = vpop.f32.mrf.mxu0 }
 0x1b2   :  { %v429_v57 = vsel %vm428_vm1, %v421_v55, -1e+30 }
 0x1b3   :  { %430 = vmax.xlane.f32.xlu0 %v429_v57  ;;  %v423_v58 = vpop.f32.mrf.mxu0 }
 0x1b5   :  { %v562_v59 = vpop.f32.mrf.mxu0 }
 0x23c   :  { %v431_v60 = vpop.xlane.xlu0 %430 }
 0x23d   :  { %v432_v61 = vsub.f32 %v421_v55, %v431_v60 }
 0x23f   :  { %v433_v62 = vmul.f32 1.442695, %v432_v61 }
 0x241   :  { %600 = vpow2.f32 %v433_v62 }
 0x24e   :  { %v601_v63 = vpop.eup %600 }
 0x24f   :  { %v435_v0 = vsel %vm428_vm1, %v601_v63, 0.0 }
 0x250   :  { %436 = vadd.xlane.f32.xlu0 %v435_v0 }
 0x2d9   :  { %v437_v1 = vpop.xlane.xlu0 %436 }
 0x2da   :  { %602 = vlog2.f32 %v437_v1 }
 0x2e7   :  { %v603_v2 = vpop.eup %602 }
 0x2e8   :  { %v439_v3 = vmul.f32 0.6931472, %v603_v2 }
 0x2ea   :  { %v440_v4 = vsub.f32 %v432_v61, %v439_v3 }
 0x2ec   :  { %441 = vst [vmem:[%s772_s5] sm:$0xff] %v440_v4 }

</bundles_post_ra>
